<compile_context>
chip_gen: v5e
topology: v5e:2x2
jax: 0.10.0
libtpu: 0.0.40
codegen_flags: <defaults>
</compile_context>

<pallas_src>
import jax
import jax.numpy as jnp
from jax.experimental import pallas as pl
from jax.experimental.pallas import tpu as pltpu


HIDDEN = 256
SUBLANE = 8          # f32 sublane multiple
K_ALIGN = 32         # pad the concat (state|goal|action) feature dim to this
MAX_BLOCK_B = 2048   # batch tile upper bound; working set ~5-6 MiB, fits all gens
MIN_BATCH_STEPS = 2  # aim for >=2 grid steps so v7x's 2 TensorCores both get work


def _round_up(n, m):
    return ((n + m - 1) // m) * m


def _cdiv(a, b):
    return -(-a // b)


def critic_kernel(x_ref, w1_ref, b1_ref, w2_ref, b2_ref, w3_ref, b3_ref, out_ref):
    # fc1 + ReLU: single fused matmul over the zero-padded concatenated input.
    h1 = jnp.dot(x_ref[...], w1_ref[...],
                 preferred_element_type=jnp.float32,
                 precision=jax.lax.Precision.HIGHEST) + b1_ref[...]
    h1 = jnp.maximum(h1, 0.0)

    # fc2 + ReLU
    h2 = jnp.dot(h1, w2_ref[...],
                 preferred_element_type=jnp.float32,
                 precision=jax.lax.Precision.HIGHEST) + b2_ref[...]
    h2 = jnp.maximum(h2, 0.0)

    # fc3: N=1 output -> VPU multiply + lane (XLU) reduction; keeps the MXU free
    # and avoids lane-padding a (256,1) weight in VMEM.
    out_ref[...] = (jnp.sum(h2 * w3_ref[...], axis=-1, keepdims=True)
                    + b3_ref[...])


def critic_forward(state, goal, action, params, *, max_block_b=MAX_BLOCK_B):
    """state: (B, S), goal: (B, G), action: (B, A)  ->  (B, 1) float32."""
    B = state.shape[0]
    w1p = params["w1_padded"]          # (k_pad, HIDDEN), zero rows beyond the real K
    k_pad = w1p.shape[0]

    # Wrapper-side concat (fused under jit) + zero-pad K to match w1_padded.
    x = jnp.concatenate([state, goal, action], axis=1).astype(jnp.float32)
    k = x.shape[1]
    assert k <= k_pad, "params were built for a smaller input dim"
    if k_pad != k:
        x = jnp.pad(x, ((0, 0), (0, k_pad - k)))

    # Batch tiling: big sublane-aligned block, no batch padding — the ragged
    # last block is masked by Pallas. Keep >=2 steps when possible (v7x megacore).
    steps = max(_cdiv(B, max_block_b), MIN_BATCH_STEPS)
    bb = _round_up(_cdiv(B, steps), SUBLANE)
    bb = min(bb, _round_up(B, SUBLANE))
    num_blocks = _cdiv(B, bb)

    resident = lambda i: (0, 0)   # weights/biases: same block every grid step

    out = pl.pallas_call(
        critic_kernel,
        out_shape=jax.ShapeDtypeStruct((B, 1), jnp.float32),
        grid=(num_blocks,),
        in_specs=[
            pl.BlockSpec((bb, k_pad), lambda i: (i, 0)),   # x     (tiled over batch)
            pl.BlockSpec((k_pad, HIDDEN), resident),       # w1    (resident)
            pl.BlockSpec((1, HIDDEN), resident),           # b1
            pl.BlockSpec((HIDDEN, HIDDEN), resident),      # w2
            pl.BlockSpec((1, HIDDEN), resident),           # b2
            pl.BlockSpec((1, HIDDEN), resident),           # w3 row-vector
            pl.BlockSpec((1, 1), resident),                # b3
        ],
        out_specs=pl.BlockSpec((bb, 1), lambda i: (i, 0)),
        compiler_params=pltpu.CompilerParams(
            # batch blocks are independent -> megacore sharding on v7x
            dimension_semantics=("parallel",),
        ),
    )(x, w1p, params["b1"], params["w2"], params["b2"], params["w3"], params["b3"])

    return out


def init_params(key, state_dim, goal_dim, action_dim):
    """Deterministic synthetic init (PyTorch-style uniform(-1/sqrt(fan_in), ...)).

    Stores both the natural fc1 weight (for the reference) and a K-padded copy
    (for the kernel), so the pad happens once, not per forward call.
    """
    in1 = state_dim + goal_dim + action_dim
    keys = jax.random.split(key, 6)

    def uni(k, shape, fan_in):
        bound = 1.0 / jnp.sqrt(jnp.float32(fan_in))
        return jax.random.uniform(k, shape, jnp.float32, -bound, bound)

    w1 = uni(keys[0], (in1, HIDDEN), in1)           # (in, out) = torch weight.T
    k_pad = _round_up(in1, K_ALIGN)
    w1_padded = jnp.pad(w1, ((0, k_pad - in1), (0, 0))) if k_pad != in1 else w1

    return {
        "w1": w1,
        "w1_padded": w1_padded,
        "b1": uni(keys[1], (1, HIDDEN), in1),
        "w2": uni(keys[2], (HIDDEN, HIDDEN), HIDDEN),
        "b2": uni(keys[3], (1, HIDDEN), HIDDEN),
        "w3": uni(keys[4], (1, HIDDEN), HIDDEN),    # fc3 weight stored as a row vector
        "b3": uni(keys[5], (1, 1), HIDDEN),
    }


def critic_reference(state, goal, action, params):
    x = jnp.concatenate([state, goal, action], axis=1)
    h1 = jnp.maximum(x @ params["w1"] + params["b1"], 0.0)
    h2 = jnp.maximum(h1 @ params["w2"] + params["b2"], 0.0)
    return h2 @ params["w3"].T + params["b3"]


if __name__ == "__main__":
    # Small shapes consistent with the module (state_dim = nq + nv, goal_dim = 3,
    # action_dim = model.nu) — synthetic stand-ins, no MuJoCo needed.
    STATE_DIM, GOAL_DIM, ACTION_DIM = 16, 3, 8

    key = jax.random.PRNGKey(0)
    k_s, k_g, k_a, k_p = jax.random.split(key, 4)
    params = init_params(k_p, STATE_DIM, GOAL_DIM, ACTION_DIM)

    forward = jax.jit(critic_forward)

    ok = True
    # B=8: exact tiles.  B=67: exercises the ragged (masked) final batch block.
    for B in (8, 67):
        ks, kg, ka = jax.random.split(jax.random.fold_in(key, B), 3)
        state = jax.random.normal(ks, (B, STATE_DIM), jnp.float32)
        goal = jax.random.normal(kg, (B, GOAL_DIM), jnp.float32)
        action = jax.random.normal(ka, (B, ACTION_DIM), jnp.float32)

        out = jax.block_until_ready(forward(state, goal, action, params))
        ref = critic_reference(state, goal, action, params)

        ok &= out.shape == (B, 1)
        ok &= bool(jnp.allclose(out, ref, atol=1e-5, rtol=1e-5))

    assert ok
    print("KERNEL_OK")
</pallas_src>

<mosaic_0001>
module attributes {stable_mosaic.version = 11 : i64} {
  func.func @critic_kernel(%arg0: i32, %arg1: memref<8x32xf32, #tpu.memory_space<vmem>>, %arg2: memref<32x256xf32, #tpu.memory_space<vmem>>, %arg3: memref<1x256xf32, #tpu.memory_space<vmem>>, %arg4: memref<256x256xf32, #tpu.memory_space<vmem>>, %arg5: memref<1x256xf32, #tpu.memory_space<vmem>>, %arg6: memref<1x256xf32, #tpu.memory_space<vmem>>, %arg7: memref<1x1xf32, #tpu.memory_space<vmem>>, %arg8: memref<8x1xf32, #tpu.memory_space<vmem>>) attributes {dimension_semantics = [#tpu.dimension_semantics<parallel>], iteration_bounds = array<i64: 1>, scalar_prefetch = 0 : i64, scratch_operands = 0 : i64, tpu.core_type = #tpu.core_type<tc>, window_params = [{transform_indices = @transform_0, window_bounds = array<i64: 8, 32>}, {pipeline_mode = #tpu.pipeline_mode<synchronous>, transform_indices = @transform_1, window_bounds = array<i64: 32, 256>}, {pipeline_mode = #tpu.pipeline_mode<synchronous>, transform_indices = @transform_2, window_bounds = array<i64: 1, 256>}, {pipeline_mode = #tpu.pipeline_mode<synchronous>, transform_indices = @transform_3, window_bounds = array<i64: 256, 256>}, {pipeline_mode = #tpu.pipeline_mode<synchronous>, transform_indices = @transform_4, window_bounds = array<i64: 1, 256>}, {pipeline_mode = #tpu.pipeline_mode<synchronous>, transform_indices = @transform_5, window_bounds = array<i64: 1, 256>}, {pipeline_mode = #tpu.pipeline_mode<synchronous>, transform_indices = @transform_6, window_bounds = array<i64: 1, 1>}, {transform_indices = @transform_7, window_bounds = array<i64: 8, 1>}]} {
    %c0 = arith.constant 0 : index
    %c0_0 = arith.constant 0 : index
    %0 = vector.load %arg1[%c0, %c0_0] : memref<8x32xf32, #tpu.memory_space<vmem>>, vector<8x32xf32>
    %c0_1 = arith.constant 0 : index
    %c0_2 = arith.constant 0 : index
    %1 = vector.load %arg2[%c0_1, %c0_2] : memref<32x256xf32, #tpu.memory_space<vmem>>, vector<32x256xf32>
    %cst = arith.constant dense<0.000000e+00> : vector<8x256xf32>
    %2 = tpu.matmul %0, %1, %cst {dimension_numbers = #tpu.dot_dimension_numbers<[1], [0], [0], [1], [0, 0, 1, 1], [], []>, precision = #tpu.contract_precision<fp32>} : vector<8x32xf32>, vector<32x256xf32>, vector<8x256xf32> -> vector<8x256xf32>
    %c0_3 = arith.constant 0 : index
    %c0_4 = arith.constant 0 : index
    %3 = vector.load %arg3[%c0_3, %c0_4] : memref<1x256xf32, #tpu.memory_space<vmem>>, vector<1x256xf32>
    %4 = vector.broadcast %3 : vector<1x256xf32> to vector<8x256xf32>
    %5 = arith.addf %2, %4 : vector<8x256xf32>
    %cst_5 = arith.constant 0.000000e+00 : f32
    %6 = vector.broadcast %cst_5 : f32 to vector<8x256xf32>
    %7 = arith.maximumf %5, %6 : vector<8x256xf32>
    %c0_6 = arith.constant 0 : index
    %c0_7 = arith.constant 0 : index
    %8 = vector.load %arg4[%c0_6, %c0_7] : memref<256x256xf32, #tpu.memory_space<vmem>>, vector<256x256xf32>
    %cst_8 = arith.constant dense<0.000000e+00> : vector<8x256xf32>
    %9 = tpu.matmul %7, %8, %cst_8 {dimension_numbers = #tpu.dot_dimension_numbers<[1], [0], [0], [1], [0, 0, 1, 1], [], []>, precision = #tpu.contract_precision<fp32>} : vector<8x256xf32>, vector<256x256xf32>, vector<8x256xf32> -> vector<8x256xf32>
    %c0_9 = arith.constant 0 : index
    %c0_10 = arith.constant 0 : index
    %10 = vector.load %arg5[%c0_9, %c0_10] : memref<1x256xf32, #tpu.memory_space<vmem>>, vector<1x256xf32>
    %11 = vector.broadcast %10 : vector<1x256xf32> to vector<8x256xf32>
    %12 = arith.addf %9, %11 : vector<8x256xf32>
    %cst_11 = arith.constant 0.000000e+00 : f32
    %13 = vector.broadcast %cst_11 : f32 to vector<8x256xf32>
    %14 = arith.maximumf %12, %13 : vector<8x256xf32>
    %c0_12 = arith.constant 0 : index
    %c0_13 = arith.constant 0 : index
    %15 = vector.load %arg6[%c0_12, %c0_13] : memref<1x256xf32, #tpu.memory_space<vmem>>, vector<1x256xf32>
    %16 = vector.broadcast %15 : vector<1x256xf32> to vector<8x256xf32>
    %17 = arith.mulf %14, %16 : vector<8x256xf32>
    %cst_14 = arith.constant dense<0.000000e+00> : vector<8xf32>
    %18 = vector.multi_reduction <add>, %17, %cst_14 [1] : vector<8x256xf32> to vector<8xf32>
    %19 = vector.shape_cast %18 : vector<8xf32> to vector<8x1xf32>
    %c0_15 = arith.constant 0 : index
    %c0_16 = arith.constant 0 : index
    %20 = vector.load %arg7[%c0_15, %c0_16] : memref<1x1xf32, #tpu.memory_space<vmem>>, vector<1x1xf32>
    %21 = vector.broadcast %20 : vector<1x1xf32> to vector<8x1xf32>
    %22 = arith.addf %19, %21 : vector<8x1xf32>
    %c0_17 = arith.constant 0 : index
    %c0_18 = arith.constant 0 : index
    %23 = vector.load %arg8[%c0_17, %c0_18] : memref<8x1xf32, #tpu.memory_space<vmem>>, vector<8x1xf32>
    tpu.vector_store %arg8[%c0_17, %c0_18], %22 {strides = array<i32>} : memref<8x1xf32, #tpu.memory_space<vmem>>, vector<8x1xf32>,
    return
  }
  func.func @transform_0(%arg0: i32) -> (i32, i32) {
    %c0_i32 = arith.constant 0 : i32
    %c0_i32_0 = arith.constant 0 : i32
    return %arg0, %c0_i32 : i32, i32
  }
  func.func @transform_1(%arg0: i32) -> (i32, i32) {
    %c0_i32 = arith.constant 0 : i32
    %c0_i32_0 = arith.constant 0 : i32
    %c0_i32_1 = arith.constant 0 : i32
    return %c0_i32, %c0_i32_0 : i32, i32
  }
  func.func @transform_2(%arg0: i32) -> (i32, i32) {
    %c0_i32 = arith.constant 0 : i32
    %c0_i32_0 = arith.constant 0 : i32
    %c0_i32_1 = arith.constant 0 : i32
    return %c0_i32, %c0_i32_0 : i32, i32
  }
  func.func @transform_3(%arg0: i32) -> (i32, i32) {
    %c0_i32 = arith.constant 0 : i32
    %c0_i32_0 = arith.constant 0 : i32
    %c0_i32_1 = arith.constant 0 : i32
    return %c0_i32, %c0_i32_0 : i32, i32
  }
  func.func @transform_4(%arg0: i32) -> (i32, i32) {
    %c0_i32 = arith.constant 0 : i32
    %c0_i32_0 = arith.constant 0 : i32
    %c0_i32_1 = arith.constant 0 : i32
    return %c0_i32, %c0_i32_0 : i32, i32
  }
  func.func @transform_5(%arg0: i32) -> (i32, i32) {
    %c0_i32 = arith.constant 0 : i32
    %c0_i32_0 = arith.constant 0 : i32
    %c0_i32_1 = arith.constant 0 : i32
    return %c0_i32, %c0_i32_0 : i32, i32
  }
  func.func @transform_6(%arg0: i32) -> (i32, i32) {
    %c0_i32 = arith.constant 0 : i32
    %c0_i32_0 = arith.constant 0 : i32
    %c0_i32_1 = arith.constant 0 : i32
    return %c0_i32, %c0_i32_0 : i32, i32
  }
  func.func @transform_7(%arg0: i32) -> (i32, i32) {
    %c0_i32 = arith.constant 0 : i32
    %c0_i32_0 = arith.constant 0 : i32
    return %arg0, %c0_i32 : i32, i32
  }
}

</mosaic_0001>

<bundles_post_ra>
// kernel: critic_forward.1
= control target key start
LH: loop header
LB: loop body
LE: loop exit
PB: predicated region body
PF: predicated region fallthrough
CT: control target
= control target key end

     0   :  { %s3158_s0 = inlined_call_operand.vmem [shape: f32[8,32], index: 0, kind: input, shape index: {}]   ;;  %s3159_s1 = inlined_call_operand.hbm [shape: f32[32,256], index: 1, kind: input, shape index: {}]   ;;  %s3160_s2 = inlined_call_operand.vmem [shape: f32[1,256], index: 2, kind: input, shape index: {}]   ;;  %s3161_s3 = inlined_call_operand.hbm [shape: f32[256,256], index: 3, kind: input, shape index: {}]   ;;  %s3162_s4 = inlined_call_operand.vmem [shape: f32[1,256], index: 4, kind: input, shape index: {}]   ;;  %s3163_s5 = inlined_call_operand.vmem [shape: f32[1,256], index: 5, kind: input, shape index: {}]   ;;  %s3164_s6 = inlined_call_operand.<no memory space> [shape: f32[1,1], index: 6, kind: input, shape index: {}]   ;;  %s3165_s7 = inlined_call_operand.vmem [shape: f32[8,1], index: 7, kind: output, shape index: {}]  }
   0x1   :  { %v12_v0 = vstv %s3164_s6 }
   0x2   :  { %13 = vst [vmem:[#allocation2] sm:$0x1] %v12_v0 }
   0x3   :  { %14 = vsyncpa [#allocation4], 0  ;;  %s22_s28 = sshll.u32 %s3159_s1, 4  ;;  %s23_s28 = int_to_ptr.hbm [resolvable:$true] %s22_s28 }
   0x4   :  { %15 = vsyncpa [#allocation6], 0  ;;  %s1968_s29 = smov [#allocation3]   ;;  %s37_s10 = sshll.u32 %s3161_s3, 4  ;;  %s38_s10 = int_to_ptr.hbm [resolvable:$true] %s37_s10 }
   0x5   :  { %s24_s30 = sshll.u32 %s1968_s29, 4  ;;  %s1969_s11 = smov 256   ;;  %s25_s30 = int_to_ptr.vmem [resolvable:$true] %s24_s30 }
   0x6   :  { %s1970_s12 = smov 16   ;;  %s1971_s6 = smov [#allocation5]  }
   0x7   :  { %30 = dma.hbm_to_vmem [thread:$0]  %s23_s28, 1024, %s25_s30, [#allocation4], %s1969_s11, %s1969_s11, %s1970_s12  }
   0x8   :  { %s39_s13 = sshll.u32 %s1971_s6, 4  ;;  %s40_s13 = int_to_ptr.vmem [resolvable:$true] %s39_s13 }
   0x9   :  { %45 = dma.hbm_to_vmem [thread:$0]  %s38_s10, 8192, %s40_s13, [#allocation6], %s1969_s11, %s1969_s11, %s1970_s12  }
   0xa   :  { %1964 = dma.done.wait [#allocation4], 1024  }
   0xb   :  { %1965 = vsyncadd [#allocation4], 4294966272 }
   0xc   :  { %1966 = dma.done.wait [#allocation6], 8192  }
   0xd   :  { %1967 = vsyncadd [#allocation6], 4294959104  ;;  %vm75_vm0 = vcmask 261120   ;;  %v67_v1 = vld [vmem:[#allocation3 + $0x30] sm:$0xff]  ;;  %v65_v2 = vld [vmem:[#allocation3 + $0x20] sm:$0xff]  ;;  %vm1903_vm1 = vcmask 7168  }
   0xe   :  { %v63_v3 = vld [vmem:[#allocation3 + $0x10] sm:$0xff]  ;;  %v2021_v4 = vand.u32 4294901760, %v67_v1  ;;  %v2023_v5 = vand.u32 4294901760, %v65_v2  ;;  %v61_v7 = vld [vmem:[#allocation3] sm:$0xff]  ;;  %v68_v9 = vld [vmem:[#allocation3 + $0x38] sm:$0xff] }
   0xf   :  { %v2025_v6 = vand.u32 4294901760, %v63_v3  ;;  %v60_v8 = vld [vmem:[%s3158_s0] sm:$0xff]  ;;  %v2030_v10 = vand.u32 4294901760, %v61_v7  ;;  %v2032_v12 = vand.u32 4294901760, %v68_v9  ;;  %v66_v13 = vld [vmem:[#allocation3 + $0x28] sm:$0xff]  ;;  %v481_v53 = vld [vmem:[#allocation5 + $0xf0] sm:$0xff] }
  0x10   :  { %v77_v11 = vsel %vm75_vm0, %v60_v8, 0  ;;  %v64_v14 = vld [vmem:[#allocation3 + $0x18] sm:$0xff]  ;;  %v121_v15 = vsub.f32 %v67_v1, %v2021_v4  ;;  %92 = vmatpush.msra.mxu0 %v2021_v4  ;;  %v127_v16 = vsub.f32 %v65_v2, %v2023_v5  ;;  %192 = vmatpush.msra.mxu3 %v2021_v4  ;;  %v62_v19 = vld [vmem:[#allocation3 + $0x8] sm:$0xff]  ;;  %v2046_v21 = vand.u32 4294901760, %v66_v13  ;;  %v479_v55 = vld [vmem:[#allocation5 + $0xe0] sm:$0xff] }
  0x11   :  { %v2039_v17 = vsub.f32 %v63_v3, %v2025_v6  ;;  %v2041_v18 = vand.u32 4294901760, %v77_v11  ;;  %v2044_v20 = vsub.f32 %v61_v7, %v2030_v10  ;;  %v2049_v22 = vsub.f32 %v68_v9, %v2032_v12  ;;  %v477_v58 = vld [vmem:[#allocation5 + $0xd0] sm:$0xff]  ;;  %v475_v61 = vld [vmem:[#allocation5 + $0xc0] sm:$0xff] }
  0x12   :  { %v2051_v23 = vand.u32 4294901760, %v64_v14  ;;  %163 = vmatpush.msra.mxu2 %v121_v15  ;;  %94 = vmatpush.msra.mxu0 %v2023_v5  ;;  %v122_v24 = vand.u32 4294901760, %v121_v15  ;;  %v128_v25 = vand.u32 4294901760, %v127_v16  ;;  %v2062_v30 = vsub.f32 %v66_v13, %v2046_v21  ;;  %v473_v0 = vld [vmem:[#allocation5 + $0xb0] sm:$0xff]  ;;  %v467_v13 = vld [vmem:[#allocation5 + $0x80] sm:$0xff] }
  0x13   :  { %v2055_v26 = vsub.f32 %v77_v11, %v2041_v18  ;;  %v134_v27 = vand.u32 4294901760, %v2039_v17  ;;  %194 = vmatpush.msra.mxu3 %v2023_v5  ;;  %v140_v28 = vand.u32 4294901760, %v2044_v20  ;;  %v307_v29 = vand.u32 4294901760, %v2049_v22  ;;  %v469_v8 = vld [vmem:[#allocation5 + $0x90] sm:$0xff] }
  0x14   :  { %v2064_v31 = vand.u32 4294901760, %v62_v19  ;;  %166 = vmatpush.msra.mxu2 %v127_v16  ;;  %v123_v32 = vsub.f32 %v121_v15, %v122_v24  ;;  %96 = vmatpush.msra.mxu0 %v2025_v6  ;;  %v129_v33 = vsub.f32 %v127_v16, %v128_v25  ;;  %v313_v37 = vand.u32 4294901760, %v2062_v30 }
  0x15   :  { %v135_v34 = vsub.f32 %v2039_v17, %v134_v27  ;;  %v2069_v35 = vand.u32 4294901760, %v2055_v26  ;;  %196 = vmatpush.msra.mxu3 %v2025_v6  ;;  %v308_v36 = vsub.f32 %v2049_v22, %v307_v29  ;;  %v2077_v38 = vsub.f32 %v64_v14, %v2051_v23 }
  0x16   :  { %v124_v39 = vand.u32 4294901760, %v123_v32  ;;  %169 = vmatpush.msra.mxu2 %v2039_v17  ;;  %v130_v40 = vand.u32 4294901760, %v129_v33  ;;  %98 = vmatpush.msra.mxu0 %v2030_v10  ;;  %v141_v42 = vsub.f32 %v2044_v20, %v140_v28  ;;  %v314_v44 = vsub.f32 %v2062_v30, %v313_v37  ;;  %v465_v17 = vld [vmem:[#allocation5 + $0x70] sm:$0xff] }
  0x17   :  { %v102_v41 = vsub.f32 %v2055_v26, %v2069_v35  ;;  %198 = vmatpush.msra.mxu3 %v2030_v10  ;;  %v309_v43 = vand.u32 4294901760, %v308_v36  ;;  %v319_v45 = vand.u32 4294901760, %v2077_v38  ;;  %v136_v46 = vand.u32 4294901760, %v135_v34 }
  0x18   :  { %221 = vmatpush.msrb.mxu0 %v122_v24  ;;  %125 = vmatpush.msra.mxu1 %v124_v39  ;;  %v2093_v48 = vsub.f32 %v62_v19, %v2064_v31  ;;  %v315_v49 = vand.u32 4294901760, %v314_v44  ;;  %v142_v51 = vand.u32 4294901760, %v141_v42  ;;  %v2104_v57 = vand.u32 4294901760, %v481_v53  ;;  %v463_v24 = vld [vmem:[#allocation5 + $0x60] sm:$0xff] }
  0x19   :  { %172 = vmatpush.msra.mxu2 %v2044_v20  ;;  %v103_v47 = vand.u32 4294901760, %v102_v41  ;;  %202 = vmatmul.f32.vlgmr.msra.gmra.mxu3 %v2069_v35  ;;  %v320_v50 = vsub.f32 %v2077_v38, %v319_v45  ;;  %v2108_v60 = vand.u32 4294901760, %v479_v55  ;;  %v2115_v63 = vand.u32 4294901760, %v477_v58 }
  0x1a   :  { %175 = vmatmul.f32.vlgmr.msra.gmra.mxu2 %v2055_v26  ;;  %131 = vmatpush.msra.mxu1 %v130_v40  ;;  %v325_v52 = vand.u32 4294901760, %v2093_v48  ;;  %v2113_v62 = vsub.f32 %v481_v53, %v2104_v57  ;;  %v2120_v1 = vand.u32 4294901760, %v475_v61  ;;  %v2129_v3 = vand.u32 4294901760, %v473_v0  ;;  %v457_v40 = vld [vmem:[#allocation5 + $0x30] sm:$0xff] }
  0x1b   :  { %277 = vmatpush.msrb.mxu2 %v2032_v12  ;;  %104 = vmatmul.f32.vlgmr.msra.gmra.mxu0 %v103_v47  ;;  %v321_v56 = vand.u32 4294901760, %v320_v50  ;;  %v2125_v2 = vsub.f32 %v479_v55, %v2108_v60  ;;  %v2135_v7 = vsub.f32 %v477_v58, %v2115_v63  ;;  %v2160_v16 = vand.u32 4294901760, %v469_v8  ;;  %v453_v53 = vld [vmem:[#allocation5 + $0x10] sm:$0xff] }
  0x1c   :  { %310 = vmatpush.msrb.mxu3 %v309_v43  ;;  %137 = vmatpush.msra.mxu1 %v136_v46  ;;  %v326_v54 = vsub.f32 %v2093_v48, %v325_v52  ;;  %v2198_v36 = vand.u32 4294901760, %v463_v24  ;;  %v2234_v50 = vand.u32 4294901760, %v457_v40 }
  0x1d   :  { %279 = vmatpush.msrb.mxu2 %v2046_v21  ;;  %225 = vmatpush.msrb.mxu0 %v128_v25  ;;  %v570_v9 = vand.u32 4294901760, %v2125_v2  ;;  %v576_v15 = vand.u32 4294901760, %v2135_v7 }
  0x1e   :  { %316 = vmatpush.msrb.mxu3 %v315_v49  ;;  %143 = vmatpush.msra.mxu1 %v142_v51  ;;  %v327_v59 = vand.u32 4294901760, %v326_v54  ;;  %v2222_v44 = vsub.f32 %v463_v24, %v2198_v36 }
  0x1f   :  { %281 = vmatpush.msrb.mxu2 %v2051_v23  ;;  %145 = vmatmul.f32.vlgmr.msra.gmra.mxu1 %v2041_v18  ;;  %v571_v19 = vsub.f32 %v2125_v2, %v570_v9 }
  0x20   :  { %229 = vmatpush.msrb.mxu0 %v134_v27  ;;  %252 = vmatpush.msrb.mxu1 %v2021_v4  ;;  %v471_v4 = vld [vmem:[#allocation5 + $0xa0] sm:$0xff]  ;;  %v577_v27 = vsub.f32 %v2135_v7, %v576_v15 }
  0x21   :  { %283 = vmatpush.msrb.mxu2 %v2064_v31  ;;  %322 = vmatpush.msrb.mxu3 %v321_v56  ;;  %v2146_v11 = vand.u32 4294901760, %v471_v4  ;;  %v572_v32 = vand.u32 4294901760, %v571_v19  ;;  %v618_v56 = vand.u32 4294901760, %v2222_v44  ;;  %v511_v19 = vld [vmem:[#allocation5 + $0x1e0] sm:$0xff] }
  0x22   :  { %289 = vmatmul.f32.vlgmr.msrb.gmra.mxu2 %v103_v47  ;;  %254 = vmatpush.msrb.mxu1 %v2023_v5  ;;  %v564_v5 = vand.u32 4294901760, %v2113_v62 }
  0x23   :  { %233 = vmatpush.msrb.mxu0 %v140_v28  ;;  %328 = vmatpush.msrb.mxu3 %v327_v59  ;;  %v2170_v20 = vsub.f32 %v471_v4, %v2146_v11  ;;  %v2183_v28 = vsub.f32 %v469_v8, %v2160_v16  ;;  %v451_v59 = vld [vmem:[#allocation5] sm:$0xff]  ;;  %v2256_v8 = vsub.f32 %v457_v40, %v2234_v50  ;;  %v2284_v40 = vand.u32 4294901760, %v511_v19 }
  0x24   :  { %406 = vmatpush.msra.mxu2 %v307_v29  ;;  %256 = vmatpush.msrb.mxu1 %v2025_v6  ;;  %v2141_v6 = vsub.f32 %v475_v61, %v2120_v1  ;;  %v565_v14 = vsub.f32 %v2113_v62, %v564_v5  ;;  %v2185_v29 = vand.u32 4294901760, %v465_v17  ;;  %v513_v61 = vld [vmem:[#allocation5 + $0x1f0] sm:$0xff] }
  0x25   :  { %235 = vmatmul.f32.vlgmr.msrb.gmra.mxu0 %v2041_v18  ;;  %330 = vmatmul.f32.vlgmr.msrb.gmra.mxu3 %v2041_v18  ;;  %v594_v33 = vand.u32 4294901760, %v2170_v20 }
  0x26   :  { %348 = vmatpush.msra.mxu0 %v2049_v22  ;;  %258 = vmatpush.msrb.mxu1 %v2030_v10  ;;  %v2151_v10 = vsub.f32 %v473_v0, %v2129_v3  ;;  %v2172_v22 = vand.u32 4294901760, %v467_v13  ;;  %v566_v25 = vand.u32 4294901760, %v565_v14  ;;  %v2210_v39 = vsub.f32 %v465_v17, %v2185_v29 }
  0x27   :  { %410 = vmatpush.msra.mxu2 %v313_v37  ;;  %437 = vmatpush.msra.mxu3 %v2032_v12  ;;  %v459_v37 = vld [vmem:[#allocation5 + $0x40] sm:$0xff]  ;;  %v595_v42 = vsub.f32 %v2170_v20, %v594_v33 }
  0x28   :  { %260 = vmatmul.f32.vlgmr.msrb.gmra.mxu1 %v2041_v18  ;;  %351 = vmatpush.msra.mxu0 %v2062_v30  ;;  %v461_v30 = vld [vmem:[#allocation5 + $0x50] sm:$0xff]  ;;  %v2196_v34 = vsub.f32 %v467_v13, %v2172_v22  ;;  %v612_v49 = vand.u32 4294901760, %v2210_v39  ;;  %v2258_v13 = vand.u32 4294901760, %v453_v53 }
  0x29   :  { %377 = vmatpush.msra.mxu1 %v2032_v12  ;;  %414 = vmatpush.msra.mxu2 %v319_v45  ;;  %v582_v12 = vand.u32 4294901760, %v2141_v6  ;;  %v455_v45 = vld [vmem:[#allocation5 + $0x20] sm:$0xff]  ;;  %v596_v54 = vand.u32 4294901760, %v595_v42 }
  0x2a   :  { %439 = vmatpush.msra.mxu3 %v2046_v21  ;;  %354 = vmatpush.msra.mxu0 %v2077_v38  ;;  %v600_v38 = vand.u32 4294901760, %v2183_v28  ;;  %v606_v43 = vand.u32 4294901760, %v2196_v34  ;;  %v613_v4 = vsub.f32 %v2210_v39, %v612_v49 }
  0x2b   :  { %379 = vmatpush.msra.mxu1 %v2046_v21  ;;  %418 = vmatpush.msra.mxu2 %v325_v52  ;;  %v588_v21 = vand.u32 4294901760, %v2151_v10  ;;  %v2241_v52 = vand.u32 4294901760, %v455_v45 }
  0x2c   :  { %441 = vmatpush.msra.mxu3 %v2051_v23  ;;  %420 = vmatmul.f32.vlgmr.msra.gmra.mxu2 %v2041_v18  ;;  %v607_v55 = vsub.f32 %v2196_v34, %v606_v43 }
  0x2d   :  { %357 = vmatpush.msra.mxu0 %v2093_v48  ;;  %381 = vmatpush.msra.mxu1 %v2051_v23  ;;  %v583_v23 = vsub.f32 %v2141_v6, %v582_v12  ;;  %v601_v48 = vsub.f32 %v2183_v28, %v600_v38  ;;  %v2264_v17 = vsub.f32 %v455_v45, %v2241_v52  ;;  %v507_v45 = vld [vmem:[#allocation5 + $0x1c0] sm:$0xff] }
  0x2e   :  { %443 = vmatpush.msra.mxu3 %v2064_v31  ;;  %360 = vmatmul.f32.vlgmr.msra.gmra.mxu0 %v2055_v26  ;;  %v578_v26 = vand.u32 4294901760, %v577_v27  ;;  %v608_v24 = vand.u32 4294901760, %v607_v55  ;;  %v2270_v27 = vand.u32 4294901760, %v451_v59 }
  0x2f   :  { %445 = vmatmul.f32.vlgmr.msra.gmra.mxu3 %v2041_v18  ;;  %383 = vmatpush.msra.mxu1 %v2064_v31  ;;  %v2202_v18 = vand.u32 4294901760, %v461_v30  ;;  %v589_v31 = vsub.f32 %v2151_v10, %v588_v21  ;;  %v584_v41 = vand.u32 4294901760, %v583_v23  ;;  %v602_v0 = vand.u32 4294901760, %v601_v48 }
  0x30   :  { %665 = vmatpush.msrb.mxu2 %v2113_v62  ;;  %387 = vmatmul.f32.vlgmr.msra.gmra.mxu1 %v2069_v35  ;;  %v2214_v35 = vand.u32 4294901760, %v459_v37  ;;  %v3168_v42 = vand.u32 4294901760, %v2264_v17  ;;  %v2294_v48 = vsub.f32 %v451_v59, %v2270_v27 }
  0x31   :  { %718 = vmatpush.msrb.mxu3 %v2104_v57  ;;  %567 = vmatpush.msrb.mxu1 %v566_v25  ;;  %v2227_v46 = vsub.f32 %v461_v30, %v2202_v18  ;;  %v590_v47 = vand.u32 4294901760, %v589_v31  ;;  %v619_v25 = vsub.f32 %v2222_v44, %v618_v56  ;;  %v2272_v30 = vand.u32 4294901760, %v513_v61 }
  0x32   :  { %668 = vmatpush.msrb.mxu2 %v2125_v2  ;;  %522 = vmatpush.msrb.mxu0 %v2104_v57  ;;  %v2239_v51 = vsub.f32 %v459_v37, %v2214_v35  ;;  %v614_v37 = vand.u32 4294901760, %v613_v4  ;;  %v2282_v31 = vsub.f32 %v453_v53, %v2258_v13  ;;  %v3207_v2 = vand.u32 4294901760, %v2264_v17 }
  0x33   :  { %720 = vmatpush.msrb.mxu3 %v2108_v60  ;;  %573 = vmatpush.msrb.mxu1 %v572_v32  ;;  %v3169_v58 = vand.u32 4294901760, %v2227_v46  ;;  %v509_v32 = vld [vmem:[#allocation5 + $0x1d0] sm:$0xff]  ;;  %v2297_v53 = vsub.f32 %v513_v61, %v2272_v30  ;;  %v2309_v61 = vsub.f32 %v511_v19, %v2284_v40  ;;  %v3204_v62 = vand.u32 4294901760, %v2227_v46 }
  0x34   :  { %671 = vmatpush.msrb.mxu2 %v2135_v7  ;;  %524 = vmatpush.msrb.mxu0 %v2108_v60  ;;  %v3167_v14 = vand.u32 4294901760, %v2239_v51  ;;  %v3170_v59 = vand.u32 4294901760, %v2282_v31  ;;  %v3209_v7 = vand.u32 4294901760, %v2294_v48 }
  0x35   :  { %722 = vmatpush.msrb.mxu3 %v2115_v63  ;;  %579 = vmatpush.msrb.mxu1 %v578_v26  ;;  %v625_v23 = vsub.f32 %v2227_v46, %v3169_v58  ;;  %v3166_v26 = vand.u32 4294901760, %v2256_v8 }
  0x36   :  { %674 = vmatpush.msrb.mxu2 %v2141_v6  ;;  %526 = vmatpush.msrb.mxu0 %v2115_v63 }
  0x37   :  { %724 = vmatpush.msrb.mxu3 %v2120_v1  ;;  %585 = vmatpush.msrb.mxu1 %v584_v41  ;;  %v631_v41 = vsub.f32 %v2239_v51, %v3167_v14  ;;  %v626_v55 = vand.u32 4294901760, %v625_v23  ;;  %v637_v4 = vsub.f32 %v2256_v8, %v3166_v26  ;;  %v643_v23 = vsub.f32 %v2264_v17, %v3168_v42 }
  0x38   :  { %677 = vmatpush.msrb.mxu2 %v2151_v10  ;;  %528 = vmatpush.msrb.mxu0 %v2120_v1  ;;  %v3172_v26 = vand.u32 4294901760, %v2297_v53  ;;  %v3173_v42 = vand.u32 4294901760, %v2309_v61 }
  0x39   :  { %726 = vmatpush.msrb.mxu3 %v2129_v3  ;;  %591 = vmatpush.msrb.mxu1 %v590_v47  ;;  %v620_v47 = vand.u32 4294901760, %v619_v25  ;;  %v632_v25 = vand.u32 4294901760, %v631_v41  ;;  %v638_v41 = vand.u32 4294901760, %v637_v4 }
  0x3a   :  { %680 = vmatpush.msrb.mxu2 %v2170_v20  ;;  %530 = vmatpush.msrb.mxu0 %v2129_v3  ;;  %v906_v4 = vsub.f32 %v2297_v53, %v3172_v26 }
  0x3b   :  { %728 = vmatpush.msrb.mxu3 %v2146_v11  ;;  %597 = vmatpush.msrb.mxu1 %v596_v54  ;;  %v2299_v54 = vand.u32 4294901760, %v509_v32 }
  0x3c   :  { %683 = vmatpush.msrb.mxu2 %v2183_v28  ;;  %532 = vmatpush.msrb.mxu0 %v2146_v11  ;;  %v907_v26 = vand.u32 4294901760, %v906_v4 }
  0x3d   :  { %730 = vmatpush.msrb.mxu3 %v2160_v16  ;;  %603 = vmatpush.msrb.mxu1 %v602_v0  ;;  %v505_v0 = vld [vmem:[#allocation5 + $0x1b0] sm:$0xff]  ;;  %v2322_v19 = vsub.f32 %v509_v32, %v2299_v54  ;;  %v644_v32 = vand.u32 4294901760, %v643_v23  ;;  %v912_v23 = vsub.f32 %v2309_v61, %v3173_v42 }
  0x3e   :  { %686 = vmatpush.msrb.mxu2 %v2196_v34  ;;  %534 = vmatpush.msrb.mxu0 %v2160_v16  ;;  %v2324_v14 = vand.u32 4294901760, %v505_v0 }
  0x3f   :  { %732 = vmatpush.msrb.mxu3 %v2172_v22  ;;  %609 = vmatpush.msrb.mxu1 %v608_v24  ;;  %v2311_v24 = vand.u32 4294901760, %v507_v45  ;;  %v913_v42 = vand.u32 4294901760, %v912_v23 }
  0x40   :  { %689 = vmatpush.msrb.mxu2 %v2210_v39  ;;  %536 = vmatpush.msrb.mxu0 %v2172_v22  ;;  %v493_v39 = vld [vmem:[#allocation5 + $0x150] sm:$0xff] }
  0x41   :  { %734 = vmatpush.msrb.mxu3 %v2185_v29  ;;  %615 = vmatpush.msrb.mxu1 %v614_v37  ;;  %v3171_v37 = vand.u32 4294901760, %v2294_v48  ;;  %v2334_v58 = vsub.f32 %v507_v45, %v2311_v24  ;;  %v2347_v45 = vsub.f32 %v505_v0, %v2324_v14 }
  0x42   :  { %692 = vmatpush.msrb.mxu2 %v2222_v44  ;;  %538 = vmatpush.msrb.mxu0 %v2185_v29  ;;  %v2467_v44 = vand.u32 4294901760, %v493_v39 }
  0x43   :  { %736 = vmatpush.msrb.mxu3 %v2198_v36  ;;  %621 = vmatpush.msrb.mxu1 %v620_v47  ;;  %v649_v47 = vsub.f32 %v2282_v31, %v3170_v59  ;;  %v917_v59 = vand.u32 4294901760, %v2322_v19 }
  0x44   :  { %695 = vmatpush.msrb.mxu2 %v2227_v46  ;;  %540 = vmatpush.msrb.mxu0 %v2198_v36 }
  0x45   :  { %738 = vmatpush.msrb.mxu3 %v2202_v18  ;;  %627 = vmatpush.msrb.mxu1 %v626_v55  ;;  %v655_v55 = vsub.f32 %v2294_v48, %v3171_v37  ;;  %v923_v37 = vand.u32 4294901760, %v2334_v58 }
  0x46   :  { %698 = vmatpush.msrb.mxu2 %v2239_v51  ;;  %542 = vmatpush.msrb.mxu0 %v2202_v18 }
  0x47   :  { %740 = vmatpush.msrb.mxu3 %v2214_v35  ;;  %633 = vmatpush.msrb.mxu1 %v632_v25  ;;  %v650_v25 = vand.u32 4294901760, %v649_v47  ;;  %v656_v0 = vand.u32 4294901760, %v655_v55  ;;  %v929_v47 = vand.u32 4294901760, %v2347_v45 }
  0x48   :  { %701 = vmatpush.msrb.mxu2 %v2256_v8  ;;  %544 = vmatpush.msrb.mxu0 %v2214_v35 }
  0x49   :  { %742 = vmatpush.msrb.mxu3 %v2234_v50  ;;  %639 = vmatpush.msrb.mxu1 %v638_v41  ;;  %v918_v41 = vsub.f32 %v2322_v19, %v917_v59  ;;  %v930_v4 = vsub.f32 %v2347_v45, %v929_v47 }
  0x4a   :  { %704 = vmatpush.msrb.mxu2 %v2264_v17  ;;  %546 = vmatpush.msrb.mxu0 %v2234_v50  ;;  %v489_v17 = vld [vmem:[#allocation5 + $0x130] sm:$0xff] }
  0x4b   :  { %744 = vmatpush.msrb.mxu3 %v2241_v52  ;;  %645 = vmatpush.msrb.mxu1 %v644_v32  ;;  %v924_v32 = vsub.f32 %v2334_v58, %v923_v37  ;;  %v919_v55 = vand.u32 4294901760, %v918_v41 }
  0x4c   :  { %707 = vmatpush.msrb.mxu2 %v2282_v31  ;;  %548 = vmatpush.msrb.mxu0 %v2241_v52 }
  0x4d   :  { %746 = vmatpush.msrb.mxu3 %v2258_v13  ;;  %651 = vmatpush.msrb.mxu1 %v650_v25  ;;  %v925_v25 = vand.u32 4294901760, %v924_v32 }
  0x4e   :  { %710 = vmatpush.msrb.mxu2 %v2294_v48  ;;  %550 = vmatpush.msrb.mxu0 %v2258_v13 }
  0x4f   :  { %748 = vmatpush.msrb.mxu3 %v2270_v27  ;;  %657 = vmatpush.msrb.mxu1 %v656_v0  ;;  %v487_v0 = vld [vmem:[#allocation5 + $0x120] sm:$0xff] }
  0x50   :  { %863 = vmatpush.msra.mxu2 %v2272_v30  ;;  %552 = vmatpush.msrb.mxu0 %v2270_v27 }
  0x51   :  { %908 = vmatpush.msra.mxu3 %v907_v26  ;;  %826 = vmatpush.msra.mxu1 %v2104_v57  ;;  %v931_v26 = vand.u32 4294901760, %v930_v4  ;;  %v503_v57 = vld [vmem:[#allocation5 + $0x1a0] sm:$0xff]  ;;  %v2498_v4 = vand.u32 4294901760, %v487_v0 }
  0x52   :  { %865 = vmatpush.msra.mxu2 %v2284_v40  ;;  %759 = vmatpush.msra.mxu0 %v564_v5  ;;  %v501_v5 = vld [vmem:[#allocation5 + $0x190] sm:$0xff] }
  0x53   :  { %914 = vmatpush.msra.mxu3 %v913_v42  ;;  %828 = vmatpush.msra.mxu1 %v2108_v60  ;;  %v2388_v60 = vand.u32 4294901760, %v503_v57  ;;  %v2431_v6 = vand.u32 4294901760, %v501_v5  ;;  %v2488_v42 = vand.u32 4294901760, %v489_v17 }
  0x54   :  { %867 = vmatpush.msra.mxu2 %v2299_v54  ;;  %763 = vmatpush.msra.mxu0 %v570_v9 }
  0x55   :  { %920 = vmatpush.msra.mxu3 %v919_v55  ;;  %830 = vmatpush.msra.mxu1 %v2115_v63  ;;  %v3205_v63 = vand.u32 4294901760, %v2239_v51  ;;  %v2434_v9 = vsub.f32 %v503_v57, %v2388_v60 }
  0x56   :  { %869 = vmatpush.msra.mxu2 %v2311_v24  ;;  %767 = vmatpush.msra.mxu0 %v576_v15 }
  0x57   :  { %926 = vmatpush.msra.mxu3 %v925_v25  ;;  %832 = vmatpush.msra.mxu1 %v2120_v1  ;;  %v3206_v1 = vand.u32 4294901760, %v2256_v8  ;;  %v935_v10 = vand.u32 4294901760, %v2434_v9  ;;  %v2478_v8 = vsub.f32 %v493_v39, %v2467_v44  ;;  %v2501_v25 = vsub.f32 %v489_v17, %v2488_v42 }
  0x58   :  { %871 = vmatpush.msra.mxu2 %v2324_v14  ;;  %771 = vmatpush.msra.mxu0 %v582_v12  ;;  %v497_v12 = vld [vmem:[#allocation5 + $0x170] sm:$0xff] }
  0x59   :  { %932 = vmatpush.msra.mxu3 %v931_v26  ;;  %834 = vmatpush.msra.mxu1 %v2129_v3  ;;  %v3208_v3 = vand.u32 4294901760, %v2282_v31  ;;  %v936_v20 = vsub.f32 %v2434_v9, %v935_v10  ;;  %v965_v31 = vand.u32 4294901760, %v2478_v8  ;;  %v485_v26 = vld [vmem:[#allocation5 + $0x110] sm:$0xff] }
  0x5a   :  { %873 = vmatpush.msra.mxu2 %v2388_v60  ;;  %775 = vmatpush.msra.mxu0 %v588_v21  ;;  %v2448_v21 = vand.u32 4294901760, %v497_v12 }
  0x5b   :  { %836 = vmatpush.msra.mxu1 %v2146_v11  ;;  %v499_v11 = vld [vmem:[#allocation5 + $0x180] sm:$0xff]  ;;  %v966_v32 = vsub.f32 %v2478_v8, %v965_v31 }
  0x5c   :  { %779 = vmatpush.msra.mxu0 %v594_v33  ;;  %875 = vmatpush.msra.mxu2 %v2431_v6  ;;  %v2438_v15 = vand.u32 4294901760, %v499_v11  ;;  %v937_v33 = vand.u32 4294901760, %v936_v20 }
  0x5d   :  { %838 = vmatpush.msra.mxu1 %v2160_v16  ;;  %v2441_v16 = vsub.f32 %v501_v5, %v2431_v6  ;;  %v967_v57 = vand.u32 4294901760, %v966_v32 }
  0x5e   :  { %783 = vmatpush.msra.mxu0 %v600_v38  ;;  %877 = vmatpush.msra.mxu2 %v2438_v15  ;;  %v2451_v28 = vsub.f32 %v499_v11, %v2438_v15  ;;  %v2461_v38 = vsub.f32 %v497_v12, %v2448_v21 }
  0x5f   :  { %840 = vmatpush.msra.mxu1 %v2172_v22  ;;  %v941_v22 = vand.u32 4294901760, %v2441_v16  ;;  %938 = vmatpush.msra.mxu3 %v937_v33 }
  0x60   :  { %787 = vmatpush.msra.mxu0 %v606_v43  ;;  %879 = vmatpush.msra.mxu2 %v2448_v21 }
  0x61   :  { %842 = vmatpush.msra.mxu1 %v2185_v29  ;;  %v495_v29 = vld [vmem:[#allocation5 + $0x160] sm:$0xff]  ;;  %v942_v34 = vsub.f32 %v2441_v16, %v941_v22 }
  0x62   :  { %791 = vmatpush.msra.mxu0 %v612_v49  ;;  %v953_v49 = vand.u32 4294901760, %v2461_v38 }
  0x63   :  { %844 = vmatpush.msra.mxu1 %v2198_v36  ;;  %v947_v36 = vand.u32 4294901760, %v2451_v28 }
  0x64   :  { %795 = vmatpush.msra.mxu0 %v618_v56 }
  0x65   :  { %846 = vmatpush.msra.mxu1 %v2202_v18  ;;  %v2458_v18 = vand.u32 4294901760, %v495_v29  ;;  %v948_v43 = vsub.f32 %v2451_v28, %v947_v36 }
  0x66   :  { %799 = vmatpush.msra.mxu0 %v3204_v62 }
  0x67   :  { %848 = vmatpush.msra.mxu1 %v2214_v35  ;;  %v943_v35 = vand.u32 4294901760, %v942_v34  ;;  %881 = vmatpush.msra.mxu2 %v2458_v18  ;;  %v2470_v46 = vsub.f32 %v495_v29, %v2458_v18  ;;  %v949_v51 = vand.u32 4294901760, %v948_v43 }
  0x68   :  { %803 = vmatpush.msra.mxu0 %v3205_v63  ;;  %v2507_v63 = vand.u32 4294901760, %v485_v26 }
  0x69   :  { %850 = vmatpush.msra.mxu1 %v2234_v50  ;;  %v491_v50 = vld [vmem:[#allocation5 + $0x140] sm:$0xff]  ;;  %944 = vmatpush.msra.mxu3 %v943_v35 }
  0x6a   :  { %807 = vmatpush.msra.mxu0 %v3206_v1  ;;  %883 = vmatpush.msra.mxu2 %v2467_v44  ;;  %v2475_v56 = vand.u32 4294901760, %v491_v50  ;;  %v2510_v1 = vsub.f32 %v487_v0, %v2498_v4  ;;  %v2518_v12 = vsub.f32 %v485_v26, %v2507_v63 }
  0x6b   :  { %852 = vmatpush.msra.mxu1 %v2241_v52  ;;  %v959_v52 = vand.u32 4294901760, %v2470_v46  ;;  %950 = vmatpush.msra.mxu3 %v949_v51 }
  0x6c   :  { %811 = vmatpush.msra.mxu0 %v3207_v2  ;;  %885 = vmatpush.msra.mxu2 %v2475_v56  ;;  %v2491_v48 = vsub.f32 %v491_v50, %v2475_v56  ;;  %v977_v2 = vand.u32 4294901760, %v2501_v25  ;;  %v3175_v33 = vand.u32 4294901760, %v2518_v12 }
  0x6d   :  { %854 = vmatpush.msra.mxu1 %v2258_v13  ;;  %v954_v13 = vsub.f32 %v2461_v38, %v953_v49 }
  0x6e   :  { %815 = vmatpush.msra.mxu0 %v3208_v3  ;;  %887 = vmatpush.msra.mxu2 %v2488_v42  ;;  %v971_v55 = vand.u32 4294901760, %v2491_v48  ;;  %v483_v3 = vld [vmem:[#allocation5 + $0x100] sm:$0xff]  ;;  %v978_v20 = vsub.f32 %v2501_v25, %v977_v2  ;;  %v990_v43 = vsub.f32 %v2518_v12, %v3175_v33 }
  0x6f   :  { %856 = vmatpush.msra.mxu1 %v2270_v27  ;;  %v960_v27 = vsub.f32 %v2470_v46, %v959_v52  ;;  %v955_v23 = vand.u32 4294901760, %v954_v13  ;;  %v2515_v11 = vand.u32 4294901760, %v483_v3 }
  0x70   :  { %819 = vmatpush.msra.mxu0 %v3209_v7  ;;  %v972_v62 = vsub.f32 %v2491_v48, %v971_v55  ;;  %889 = vmatpush.msra.mxu2 %v2498_v4  ;;  %v3176_v7 = vand.u32 4294901760, %v2510_v1  ;;  %v979_v39 = vand.u32 4294901760, %v978_v20  ;;  %v991_v51 = vand.u32 4294901760, %v990_v43 }
  0x71   :  { %v961_v41 = vand.u32 4294901760, %v960_v27  ;;  %956 = vmatpush.msra.mxu3 %v955_v23  ;;  %v2529_v34 = vsub.f32 %v483_v3, %v2515_v11  ;;  %v69_v27 = vld [vmem:[%s3160_s2] sm:$0x3] }
  0x72   :  { %v973_v5 = vand.u32 4294901760, %v972_v62  ;;  %891 = vmatpush.msra.mxu2 %v2507_v63  ;;  %v984_v29 = vsub.f32 %v2510_v1, %v3176_v7  ;;  %v71_v23 = vperm.slane %v69_v27, 0 }
  0x73   :  { %962 = vmatpush.msra.mxu3 %v961_v41  ;;  %v3174_v50 = vand.u32 4294901760, %v2529_v34 }
  0x74   :  { %893 = vmatpush.msra.mxu2 %v2515_v11  ;;  %v985_v35 = vand.u32 4294901760, %v984_v29  ;;  %v72_v29 = vperm.slane %v69_v27, 1 }
  0x75   :  { %968 = vmatpush.msra.mxu3 %v967_v57  ;;  %v996_v13 = vsub.f32 %v2529_v34, %v3174_v50 }
  0x77   :  { %974 = vmatpush.msra.mxu3 %v973_v5  ;;  %v997_v17 = vand.u32 4294901760, %v996_v13 }
  0x79   :  { %980 = vmatpush.msra.mxu3 %v979_v39 }
  0x7b   :  { %986 = vmatpush.msra.mxu3 %v985_v35 }
  0x7d   :  { %992 = vmatpush.msra.mxu3 %v991_v51 }
  0x7f   :  { %998 = vmatpush.msra.mxu3 %v997_v17 }
  0x98   :  { %v105_v0 = vpop.f32.mrf.mxu0 }
  0x99   :  { %v106_v41 = vadd.f32 %v105_v0, %v71_v23 }
  0x9c   :  { %v146_v32 = vpop.f32.mrf.mxu1  ;;  %v203_v62 = vpop.f32.mrf.mxu3 }
  0x9d   :  { %v176_v26 = vpop.f32.mrf.mxu2  ;;  %v147_v57 = vadd.f32 %v146_v32, %v106_v41 }
  0x9f   :  { %v177_v3 = vadd.f32 %v176_v26, %v147_v57 }
  0xa1   :  { %v204_v5 = vadd.f32 %v203_v62, %v177_v3  ;;  %v3211_v3 = vand.u32 4294901760, %v2309_v61 }
  0xa2   :  { %v236_v20 = vpop.f32.mrf.mxu0 }
  0xa3   :  { %v237_v39 = vadd.f32 %v236_v20, %v204_v5 }
  0xa5   :  { %v261_v35 = vpop.f32.mrf.mxu1  ;;  %v290_v43 = vpop.f32.mrf.mxu2 }
  0xa6   :  { %v262_v51 = vadd.f32 %v261_v35, %v237_v39  ;;  %v291_v13 = vadd.f32 %v290_v43, %v72_v29 }
  0xa8   :  { %v449_v17 = vmax.f32 %v262_v51, 0.0  ;;  %v331_v50 = vpop.f32.mrf.mxu3  ;;  %v466_v51 = vld [vmem:[#allocation5 + $0x78] sm:$0xff] }
  0xa9   :  { %v332_v7 = vadd.f32 %v331_v50, %v291_v13  ;;  %v3210_v50 = vand.u32 4294901760, %v2297_v53 }
  0xaa   :  { %v2541_v33 = vand.u32 4294901760, %v449_v17 }
  0xab   :  { %v361_v0 = vpop.f32.mrf.mxu0 }
  0xac   :  { %v2544_v23 = vsub.f32 %v449_v17, %v2541_v33  ;;  %659 = vmatmul.f32.vlgmr.msrb.gmra.mxu1 %v2541_v33  ;;  %v362_v41 = vadd.f32 %v361_v0, %v332_v7 }
  0xad   :  { %1059 = vmatpush.msrb.mxu1 %v2272_v30  ;;  %v388_v27 = vpop.f32.mrf.mxu1 }
  0xae   :  { %713 = vmatmul.f32.vlgmr.msrb.gmra.mxu2 %v2544_v23  ;;  %v2550_v32 = vand.u32 4294901760, %v2544_v23  ;;  %v389_v26 = vadd.f32 %v388_v27, %v362_v41  ;;  %v2693_v41 = vand.u32 4294901760, %v466_v51  ;;  %v3215_v27 = vand.u32 4294901760, %v2518_v12 }
  0xaf   :  { %1061 = vmatpush.msrb.mxu1 %v2284_v40  ;;  %1100 = vmatpush.msrb.mxu2 %v3210_v50  ;;  %v421_v57 = vpop.f32.mrf.mxu2 }
  0xb0   :  { %752 = vmatmul.f32.vlgmr.msrb.gmra.mxu3 %v2550_v32  ;;  %v556_v7 = vsub.f32 %v2544_v23, %v2550_v32  ;;  %v422_v62 = vadd.f32 %v421_v57, %v389_v26  ;;  %v462_v57 = vld [vmem:[#allocation5 + $0x58] sm:$0xff] }
  0xb1   :  { %1063 = vmatpush.msrb.mxu1 %v2299_v54  ;;  %1104 = vmatpush.msrb.mxu2 %v3211_v3 }
  0xb2   :  { %1167 = vmatpush.msrb.mxu3 %v2272_v30  ;;  %v446_v5 = vpop.f32.mrf.mxu3  ;;  %v2562_v20 = vand.u32 4294901760, %v556_v7 }
  0xb3   :  { %v447_v29 = vadd.f32 %v446_v5, %v422_v62  ;;  %1065 = vmatpush.msrb.mxu1 %v2311_v24  ;;  %1108 = vmatpush.msrb.mxu2 %v917_v59  ;;  %v480_v59 = vld [vmem:[#allocation5 + $0xe8] sm:$0xff] }
  0xb4   :  { %1169 = vmatpush.msrb.mxu3 %v2284_v40  ;;  %558 = vmatmul.f32.vlgmr.msrb.gmra.mxu0 %v2562_v20 }
  0xb5   :  { %v450_v39 = vmax.f32 %v447_v29, 0.0  ;;  %858 = vmatmul.f32.vlgmr.msra.gmra.mxu1 %v2541_v33  ;;  %1006 = vmatpush.msrb.mxu0 %v2297_v53  ;;  %v482_v53 = vld [vmem:[#allocation5 + $0xf8] sm:$0xff]  ;;  %v460_v29 = vld [vmem:[#allocation5 + $0x48] sm:$0xff] }
  0xb6   :  { %1067 = vmatpush.msrb.mxu1 %v2324_v14  ;;  %1112 = vmatpush.msrb.mxu2 %v923_v37  ;;  %v478_v37 = vld [vmem:[#allocation5 + $0xd8] sm:$0xff] }
  0xb7   :  { %v2574_v30 = vand.u32 4294901760, %v450_v39  ;;  %1171 = vmatpush.msrb.mxu3 %v2299_v54  ;;  %1009 = vmatpush.msrb.mxu0 %v2309_v61  ;;  %v2597_v61 = vand.u32 4294901760, %v482_v53 }
  0xb8   :  { %1069 = vmatpush.msrb.mxu1 %v2388_v60  ;;  %1116 = vmatpush.msrb.mxu2 %v929_v47 }
  0xb9   :  { %v2582_v40 = vsub.f32 %v450_v39, %v2574_v30  ;;  %1173 = vmatpush.msrb.mxu3 %v2311_v24  ;;  %1012 = vmatpush.msrb.mxu0 %v2322_v19  ;;  %v476_v19 = vld [vmem:[#allocation5 + $0xc8] sm:$0xff]  ;;  %v2615_v47 = vsub.f32 %v482_v53, %v2597_v61  ;;  %v2720_v39 = vand.u32 4294901760, %v462_v57 }
  0xba   :  { %1071 = vmatpush.msrb.mxu1 %v2431_v6  ;;  %1120 = vmatpush.msrb.mxu2 %v935_v10 }
  0xbb   :  { %3212 = vst [vmem:[#allocation9_spill] sm:$0xff] %v2582_v40  ;;  %v2590_v54 = vand.u32 4294901760, %v2582_v40  ;;  %1175 = vmatpush.msrb.mxu3 %v2324_v14  ;;  %1015 = vmatpush.msrb.mxu0 %v2334_v58  ;;  %v2605_v58 = vand.u32 4294901760, %v480_v59  ;;  %v3193_v10 = vand.u32 4294901760, %v2615_v47 }
  0xbc   :  { %1073 = vmatpush.msrb.mxu1 %v2438_v15  ;;  %1124 = vmatpush.msrb.mxu2 %v941_v22  ;;  %v472_v22 = vld [vmem:[#allocation5 + $0xa8] sm:$0xff] }
  0xbd   :  { %3213 = vst [vmem:[#allocation10_spill] sm:$0xff] %v2590_v54  ;;  %1177 = vmatpush.msrb.mxu3 %v2388_v60  ;;  %821 = vmatmul.f32.vlgmr.msra.gmra.mxu0 %v2541_v33  ;;  %v897_v24 = vsub.f32 %v2582_v40, %v2590_v54  ;;  %v474_v60 = vld [vmem:[#allocation5 + $0xb8] sm:$0xff] }
  0xbe   :  { %1018 = vmatpush.msrb.mxu0 %v2347_v45  ;;  %1075 = vmatpush.msrb.mxu1 %v2448_v21  ;;  %v2617_v45 = vand.u32 4294901760, %v478_v37 }
  0xbf   :  { %1128 = vmatpush.msrb.mxu2 %v947_v36  ;;  %1179 = vmatpush.msrb.mxu3 %v2431_v6  ;;  %v2610_v14 = vand.u32 4294901760, %v897_v24  ;;  %v2625_v6 = vsub.f32 %v480_v59, %v2605_v58  ;;  %v470_v36 = vld [vmem:[#allocation5 + $0x98] sm:$0xff] }
  0xc0   :  { %1021 = vmatpush.msrb.mxu0 %v2434_v9  ;;  %1077 = vmatpush.msrb.mxu1 %v2458_v18  ;;  %v2627_v9 = vand.u32 4294901760, %v476_v19  ;;  %v458_v24 = vld [vmem:[#allocation5 + $0x38] sm:$0xff] }
  0xc1   :  { %1132 = vmatpush.msrb.mxu2 %v953_v49  ;;  %1181 = vmatpush.msrb.mxu3 %v2438_v15  ;;  %v2636_v15 = vsub.f32 %v478_v37, %v2617_v45  ;;  %v2651_v49 = vand.u32 4294901760, %v472_v22 }
  0xc2   :  { %899 = vmatmul.f32.vlgmr.msra.gmra.mxu2 %v2610_v14  ;;  %1024 = vmatpush.msrb.mxu0 %v2441_v16  ;;  %v2638_v16 = vand.u32 4294901760, %v474_v60 }
  0xc3   :  { %1079 = vmatpush.msrb.mxu1 %v2467_v44  ;;  %1136 = vmatpush.msrb.mxu2 %v959_v52  ;;  %v468_v52 = vld [vmem:[#allocation5 + $0x88] sm:$0xff] }
  0xc4   :  { %1183 = vmatpush.msrb.mxu3 %v2448_v21  ;;  %1027 = vmatpush.msrb.mxu0 %v2451_v28  ;;  %v3192_v21 = vand.u32 4294901760, %v2625_v6  ;;  %v2647_v28 = vsub.f32 %v476_v19, %v2627_v9  ;;  %v2661_v35 = vsub.f32 %v474_v60, %v2638_v16  ;;  %v2674_v43 = vand.u32 4294901760, %v468_v52 }
  0xc5   :  { %1000 = vmatmul.f32.vlgmr.msra.gmra.mxu3 %v2574_v30  ;;  %1081 = vmatpush.msrb.mxu1 %v2475_v56  ;;  %v2732_v19 = vand.u32 4294901760, %v460_v29 }
  0xc6   :  { %1140 = vmatpush.msrb.mxu2 %v965_v31  ;;  %1185 = vmatpush.msrb.mxu3 %v2458_v18  ;;  %v1247_v18 = vsub.f32 %v2615_v47, %v3193_v10  ;;  %v3190_v31 = vand.u32 4294901760, %v2636_v15  ;;  %v3188_v17 = vand.u32 4294901760, %v2661_v35  ;;  %v2702_v50 = vsub.f32 %v468_v52, %v2674_v43 }
  0xc7   :  { %1030 = vmatpush.msrb.mxu0 %v2461_v38  ;;  %1083 = vmatpush.msrb.mxu1 %v2488_v42  ;;  %v2663_v38 = vand.u32 4294901760, %v470_v36  ;;  %v2744_v52 = vand.u32 4294901760, %v458_v24 }
  0xc8   :  { %1144 = vmatpush.msrb.mxu2 %v971_v55  ;;  %1187 = vmatpush.msrb.mxu3 %v2467_v44  ;;  %v1253_v44 = vsub.f32 %v2625_v6, %v3192_v21  ;;  %v3189_v55 = vand.u32 4294901760, %v2647_v28  ;;  %v1259_v13 = vsub.f32 %v2636_v15, %v3190_v31  ;;  %v1271_v3 = vsub.f32 %v2661_v35, %v3188_v17  ;;  %v500_v17 = vld [vmem:[#allocation5 + $0x188] sm:$0xff] }
  0xc9   :  { %1033 = vmatpush.msrb.mxu0 %v2470_v46  ;;  %1085 = vmatpush.msrb.mxu1 %v2498_v4  ;;  %v2679_v46 = vsub.f32 %v472_v22, %v2651_v49  ;;  %v2689_v0 = vsub.f32 %v470_v36, %v2663_v38  ;;  %v3185_v59 = vand.u32 4294901760, %v2702_v50  ;;  %v2742_v36 = vsub.f32 %v462_v57, %v2720_v39 }
  0xca   :  { %1148 = vmatpush.msrb.mxu2 %v977_v2  ;;  %1189 = vmatpush.msrb.mxu3 %v2475_v56  ;;  %v3214_v2 = vand.u32 4294901760, %v2510_v1  ;;  %v1248_v56 = vand.u32 4294901760, %v1247_v18  ;;  %v1265_v26 = vsub.f32 %v2647_v28, %v3189_v55  ;;  %v1260_v62 = vand.u32 4294901760, %v1259_v13  ;;  %v494_v55 = vld [vmem:[#allocation5 + $0x158] sm:$0xff] }
  0xcb   :  { %1036 = vmatpush.msrb.mxu0 %v2478_v8  ;;  %1087 = vmatpush.msrb.mxu1 %v2507_v63  ;;  %v464_v8 = vld [vmem:[#allocation5 + $0x68] sm:$0xff]  ;;  %v3186_v5 = vand.u32 4294901760, %v2689_v0  ;;  %v1272_v60 = vand.u32 4294901760, %v1271_v3  ;;  %v1289_v18 = vsub.f32 %v2702_v50, %v3185_v59  ;;  %v2888_v21 = vand.u32 4294901760, %v500_v17 }
  0xcc   :  { %1152 = vmatpush.msrb.mxu2 %v3214_v2  ;;  %1191 = vmatpush.msrb.mxu3 %v2488_v42  ;;  %v1254_v42 = vand.u32 4294901760, %v1253_v44  ;;  %v2707_v7 = vand.u32 4294901760, %v464_v8  ;;  %v1266_v53 = vand.u32 4294901760, %v1265_v26  ;;  %v454_v44 = vld [vmem:[#allocation5 + $0x18] sm:$0xff]  ;;  %v2766_v26 = vsub.f32 %v458_v24, %v2744_v52 }
  0xcd   :  { %1039 = vmatpush.msrb.mxu0 %v2491_v48  ;;  %1089 = vmatpush.msrb.mxu1 %v2515_v11  ;;  %v3187_v48 = vand.u32 4294901760, %v2679_v46  ;;  %v1283_v22 = vsub.f32 %v2689_v0, %v3186_v5  ;;  %v2768_v57 = vand.u32 4294901760, %v454_v44 }
  0xce   :  { %1156 = vmatpush.msrb.mxu2 %v3215_v27  ;;  %1193 = vmatpush.msrb.mxu3 %v2498_v4  ;;  %v3216_v4 = vand.u32 4294901760, %v2529_v34  ;;  %v2730_v37 = vsub.f32 %v464_v8, %v2707_v7  ;;  %v452_v8 = vld [vmem:[#allocation5 + $0x8] sm:$0xff] }
  0xcf   :  { %1093 = vmatmul.f32.vlgmr.msrb.gmra.mxu1 %v2590_v54  ;;  %1042 = vmatpush.msrb.mxu0 %v2501_v25  ;;  %v2718_v25 = vsub.f32 %v466_v51, %v2693_v41 }
  0xd0   :  { %1249 = vmatpush.msra.mxu1 %v1248_v56  ;;  %1160 = vmatpush.msrb.mxu2 %v3216_v4  ;;  %v3181_v2 = vand.u32 4294901760, %v2730_v37  ;;  %v2754_v56 = vsub.f32 %v460_v29, %v2732_v19  ;;  %v2780_v29 = vand.u32 4294901760, %v452_v8 }
  0xd1   :  { %1195 = vmatpush.msrb.mxu3 %v2507_v63  ;;  %1162 = vmatmul.f32.vlgmr.msrb.gmra.mxu2 %v2574_v30  ;;  %v1277_v63 = vsub.f32 %v2679_v46, %v3187_v48  ;;  %v502_v48 = vld [vmem:[#allocation5 + $0x198] sm:$0xff] }
  0xd2   :  { %1255 = vmatpush.msra.mxu1 %v1254_v42  ;;  %1347 = vmatpush.msra.mxu2 %v2615_v47  ;;  %v3179_v42 = vand.u32 4294901760, %v2742_v36  ;;  %v1301_v4 = vsub.f32 %v2730_v37, %v3181_v2  ;;  %v508_v2 = vld [vmem:[#allocation5 + $0x1c8] sm:$0xff]  ;;  %v2875_v31 = vand.u32 4294901760, %v502_v48 }
  0xd3   :  { %1045 = vmatpush.msrb.mxu0 %v2510_v1  ;;  %1197 = vmatpush.msrb.mxu3 %v2515_v11  ;;  %v456_v1 = vld [vmem:[#allocation5 + $0x28] sm:$0xff]  ;;  %v3183_v11 = vand.u32 4294901760, %v2718_v25  ;;  %v1278_v51 = vand.u32 4294901760, %v1277_v63  ;;  %v3178_v63 = vand.u32 4294901760, %v2766_v26 }
  0xd4   :  { %1199 = vmatmul.f32.vlgmr.msrb.gmra.mxu3 %v2574_v30  ;;  %1261 = vmatpush.msra.mxu1 %v1260_v62  ;;  %v2756_v13 = vand.u32 4294901760, %v456_v1  ;;  %v3177_v62 = vand.u32 4294901760, %v2754_v56  ;;  %v1307_v24 = vsub.f32 %v2742_v36, %v3179_v42  ;;  %v510_v42 = vld [vmem:[#allocation5 + $0x1d8] sm:$0xff] }
  0xd5   :  { %1350 = vmatpush.msra.mxu2 %v2625_v6  ;;  %1400 = vmatpush.msra.mxu3 %v2597_v61  ;;  %v1295_v27 = vsub.f32 %v2718_v25, %v3183_v11  ;;  %v506_v11 = vld [vmem:[#allocation5 + $0x1b8] sm:$0xff] }
  0xd6   :  { %1048 = vmatpush.msrb.mxu0 %v2518_v12  ;;  %1267 = vmatpush.msra.mxu1 %v1266_v53  ;;  %v1284_v12 = vand.u32 4294901760, %v1283_v22  ;;  %v2778_v3 = vsub.f32 %v456_v1, %v2756_v13  ;;  %v1302_v22 = vand.u32 4294901760, %v1301_v4  ;;  %v1313_v1 = vsub.f32 %v2754_v56, %v3177_v62 }
  0xd7   :  { %1353 = vmatpush.msra.mxu2 %v2636_v15  ;;  %1402 = vmatpush.msra.mxu3 %v2605_v58  ;;  %v1296_v53 = vand.u32 4294901760, %v1295_v27  ;;  %v1319_v27 = vsub.f32 %v2766_v26, %v3178_v63 }
  0xd8   :  { %1051 = vmatpush.msrb.mxu0 %v2529_v34  ;;  %1273 = vmatpush.msra.mxu1 %v1272_v60  ;;  %v1290_v34 = vand.u32 4294901760, %v1289_v18  ;;  %v2790_v60 = vsub.f32 %v454_v44, %v2768_v57  ;;  %v3180_v18 = vand.u32 4294901760, %v2778_v3  ;;  %v514_v44 = vld [vmem:[#allocation5 + $0x1f8] sm:$0xff]  ;;  %v1314_v4 = vand.u32 4294901760, %v1313_v1 }
  0xd9   :  { %1054 = vmatmul.f32.vlgmr.msrb.gmra.mxu0 %v2582_v40  ;;  %1356 = vmatpush.msra.mxu2 %v2647_v28  ;;  %v2816_v62 = vand.u32 4294901760, %v514_v44  ;;  %v1320_v63 = vand.u32 4294901760, %v1319_v27 }
  0xda   :  { %1204 = vmatpush.msra.mxu0 %v2597_v61  ;;  %1404 = vmatpush.msra.mxu3 %v2617_v45 }
  0xdb   :  { %1279 = vmatpush.msra.mxu1 %v1278_v51  ;;  %1359 = vmatpush.msra.mxu2 %v2661_v35  ;;  %v2800_v51 = vsub.f32 %v452_v8, %v2780_v29  ;;  %v512_v8 = vld [vmem:[#allocation5 + $0x1e8] sm:$0xff]  ;;  %v2833_v27 = vsub.f32 %v514_v44, %v2816_v62  ;;  %v2845_v44 = vand.u32 4294901760, %v508_v2 }
  0xdc   :  { %1206 = vmatpush.msra.mxu0 %v2605_v58  ;;  %1406 = vmatpush.msra.mxu3 %v2627_v9  ;;  %v2824_v1 = vand.u32 4294901760, %v512_v8 }
  0xdd   :  { %1285 = vmatpush.msra.mxu1 %v1284_v12  ;;  %1362 = vmatpush.msra.mxu2 %v2679_v46  ;;  %3217 = vst [vmem:[#allocation11_spill] sm:$0xff] %v2800_v51  ;;  %v1308_v12 = vand.u32 4294901760, %v1307_v24  ;;  %v3184_v24 = vand.u32 4294901760, %v2800_v51  ;;  %v3191_v5 = vand.u32 4294901760, %v2833_v27 }
  0xde   :  { %1208 = vmatpush.msra.mxu0 %v2617_v45  ;;  %1408 = vmatpush.msra.mxu3 %v2638_v16 }
  0xdf   :  { %1291 = vmatpush.msra.mxu1 %v1290_v34  ;;  %1365 = vmatpush.msra.mxu2 %v2689_v0  ;;  %v3182_v34 = vand.u32 4294901760, %v2790_v60 }
  0xe0   :  { %1210 = vmatpush.msra.mxu0 %v2627_v9  ;;  %1410 = vmatpush.msra.mxu3 %v2651_v49 }
  0xe1   :  { %1297 = vmatpush.msra.mxu1 %v1296_v53  ;;  %1368 = vmatpush.msra.mxu2 %v2702_v50  ;;  %v1325_v53 = vsub.f32 %v2778_v3, %v3180_v18 }
  0xe2   :  { %1212 = vmatpush.msra.mxu0 %v2638_v16  ;;  %1412 = vmatpush.msra.mxu3 %v2663_v38 }
  0xe3   :  { %1303 = vmatpush.msra.mxu1 %v1302_v22  ;;  %1371 = vmatpush.msra.mxu2 %v2718_v25  ;;  %v1331_v22 = vsub.f32 %v2790_v60, %v3182_v34  ;;  %v1326_v18 = vand.u32 4294901760, %v1325_v53  ;;  %v2837_v34 = vand.u32 4294901760, %v510_v42  ;;  %v2841_v53 = vsub.f32 %v512_v8, %v2824_v1 }
  0xe4   :  { %1214 = vmatpush.msra.mxu0 %v2651_v49  ;;  %1414 = vmatpush.msra.mxu3 %v2674_v43 }
  0xe5   :  { %1309 = vmatpush.msra.mxu1 %v1308_v12  ;;  %1374 = vmatpush.msra.mxu2 %v2730_v37  ;;  %v1337_v12 = vsub.f32 %v2800_v51, %v3184_v24  ;;  %v504_v24 = vld [vmem:[#allocation5 + $0x1a8] sm:$0xff]  ;;  %v2854_v8 = vsub.f32 %v510_v42, %v2837_v34  ;;  %v1588_v42 = vsub.f32 %v2833_v27, %v3191_v5 }
  0xe6   :  { %1216 = vmatpush.msra.mxu0 %v2663_v38  ;;  %1416 = vmatpush.msra.mxu3 %v2693_v41  ;;  %v2899_v5 = vsub.f32 %v502_v48, %v2875_v31  ;;  %v2912_v48 = vsub.f32 %v500_v17, %v2888_v21 }
  0xe7   :  { %1315 = vmatpush.msra.mxu1 %v1314_v4  ;;  %1377 = vmatpush.msra.mxu2 %v2742_v36  ;;  %v1332_v4 = vand.u32 4294901760, %v1331_v22  ;;  %v1338_v59 = vand.u32 4294901760, %v1337_v12  ;;  %v3194_v22 = vand.u32 4294901760, %v2841_v53  ;;  %v2863_v12 = vsub.f32 %v508_v2, %v2845_v44  ;;  %v498_v2 = vld [vmem:[#allocation5 + $0x178] sm:$0xff] }
  0xe8   :  { %1218 = vmatpush.msra.mxu0 %v2674_v43  ;;  %1418 = vmatpush.msra.mxu3 %v2707_v7  ;;  %v1589_v10 = vand.u32 4294901760, %v1588_v42  ;;  %v2901_v40 = vand.u32 4294901760, %v498_v2 }
  0xe9   :  { %1321 = vmatpush.msra.mxu1 %v1320_v63  ;;  %1380 = vmatpush.msra.mxu2 %v2754_v56  ;;  %v2849_v63 = vand.u32 4294901760, %v506_v11  ;;  %3218 = vst [vmem:[#allocation12_spill] sm:$0xff] %v2863_v12 }
  0xea   :  { %1220 = vmatpush.msra.mxu0 %v2693_v41  ;;  %1420 = vmatpush.msra.mxu3 %v2720_v39  ;;  %v2924_v17 = vsub.f32 %v498_v2, %v2901_v40 }
  0xeb   :  { %1327 = vmatpush.msra.mxu1 %v1326_v18  ;;  %1383 = vmatpush.msra.mxu2 %v2766_v26  ;;  %v2858_v18 = vand.u32 4294901760, %v504_v24 }
  0xec   :  { %1222 = vmatpush.msra.mxu0 %v2707_v7  ;;  %1422 = vmatpush.msra.mxu3 %v2732_v19 }
  0xed   :  { %1333 = vmatpush.msra.mxu1 %v1332_v4  ;;  %1386 = vmatpush.msra.mxu2 %v2778_v3  ;;  %v2870_v4 = vsub.f32 %v506_v11, %v2849_v63  ;;  %v2883_v11 = vsub.f32 %v504_v24, %v2858_v18 }
  0xee   :  { %1224 = vmatpush.msra.mxu0 %v2720_v39  ;;  %1424 = vmatpush.msra.mxu3 %v2744_v52 }
  0xef   :  { %1339 = vmatpush.msra.mxu1 %v1338_v59  ;;  %1389 = vmatpush.msra.mxu2 %v2790_v60  ;;  %3219 = vst [vmem:[#allocation13_spill] sm:$0xff] %v2870_v4  ;;  %v1594_v59 = vsub.f32 %v2841_v53, %v3194_v22  ;;  %v496_v22 = vld [vmem:[#allocation5 + $0x168] sm:$0xff] }
  0xf0   :  { %1226 = vmatpush.msra.mxu0 %v2732_v19  ;;  %1426 = vmatpush.msra.mxu3 %v2756_v13  ;;  %3220 = vst [vmem:[#allocation14_spill] sm:$0xff] %v2883_v11  ;;  %v2914_v54 = vand.u32 4294901760, %v496_v22 }
  0xf1   :  { %1341 = vmatmul.f32.vlgmr.msra.gmra.mxu1 %v2541_v33  ;;  %1392 = vmatpush.msra.mxu2 %v2800_v51  ;;  %v492_v51 = vld [vmem:[#allocation5 + $0x148] sm:$0xff] }
  0xf2   :  { %1508 = vmatpush.msrb.mxu1 %v2597_v61  ;;  %1228 = vmatpush.msra.mxu0 %v2744_v52  ;;  %v3221_v61 = vand.u32 4294901760, %v2854_v8  ;;  %v2936_v2 = vsub.f32 %v496_v22, %v2914_v54 }
  0xf3   :  { %1428 = vmatpush.msra.mxu3 %v2768_v57  ;;  %1395 = vmatmul.f32.vlgmr.msra.gmra.mxu2 %v2544_v23  ;;  %v1595_v23 = vand.u32 4294901760, %v1594_v59  ;;  %v3223_v59 = vand.u32 4294901760, %v2870_v4 }
  0xf4   :  { %1510 = vmatpush.msrb.mxu1 %v2605_v58  ;;  %1545 = vmatpush.msrb.mxu2 %v2816_v62  ;;  %v1600_v24 = vsub.f32 %v2854_v8, %v3221_v61  ;;  %v3222_v58 = vand.u32 4294901760, %v2863_v12 }
  0xf5   :  { %1230 = vmatpush.msra.mxu0 %v2756_v13  ;;  %1430 = vmatpush.msra.mxu3 %v2780_v29  ;;  %v1612_v42 = vsub.f32 %v2870_v4, %v3223_v59  ;;  %v490_v4 = vld [vmem:[#allocation5 + $0x138] sm:$0xff] }
  0xf6   :  { %1434 = vmatmul.f32.vlgmr.msra.gmra.mxu3 %v2550_v32  ;;  %1512 = vmatpush.msrb.mxu1 %v2617_v45  ;;  %v1606_v61 = vsub.f32 %v2863_v12, %v3222_v58  ;;  %v1601_v32 = vand.u32 4294901760, %v1600_v24  ;;  %v2926_v58 = vand.u32 4294901760, %v494_v55  ;;  %v2938_v45 = vand.u32 4294901760, %v492_v51  ;;  %v488_v12 = vld [vmem:[#allocation5 + $0x128] sm:$0xff]  ;;  %v486_v24 = vld [vmem:[#allocation5 + $0x118] sm:$0xff] }
  0xf7   :  { %1547 = vmatpush.msrb.mxu2 %v2824_v1  ;;  %1590 = vmatpush.msrb.mxu3 %v1589_v10  ;;  %v3224_v10 = vand.u32 4294901760, %v2883_v11 }
  0xf8   :  { %1232 = vmatpush.msra.mxu0 %v2768_v57  ;;  %1514 = vmatpush.msrb.mxu1 %v2627_v9  ;;  %v1607_v9 = vand.u32 4294901760, %v1606_v61  ;;  %v2949_v22 = vsub.f32 %v494_v55, %v2926_v58  ;;  %v2962_v55 = vsub.f32 %v492_v51, %v2938_v45 }
  0xf9   :  { %1549 = vmatpush.msrb.mxu2 %v2837_v34  ;;  %1596 = vmatpush.msrb.mxu3 %v1595_v23  ;;  %v1618_v59 = vsub.f32 %v2883_v11, %v3224_v10  ;;  %v1613_v23 = vand.u32 4294901760, %v1612_v42  ;;  %v3225_v10 = vand.u32 4294901760, %v2615_v47  ;;  %v2951_v11 = vand.u32 4294901760, %v490_v4 }
  0xfa   :  { %1234 = vmatpush.msra.mxu0 %v2780_v29  ;;  %1516 = vmatpush.msrb.mxu1 %v2638_v16  ;;  %v3226_v16 = vand.u32 4294901760, %v2899_v5  ;;  %v3227_v47 = vand.u32 4294901760, %v2625_v6  ;;  %v3228_v42 = vand.u32 4294901760, %v2912_v48  ;;  %v3229_v6 = vand.u32 4294901760, %v2636_v15 }
  0xfb   :  { %1240 = vmatmul.f32.vlgmr.msra.gmra.mxu0 %v2562_v20  ;;  %1551 = vmatpush.msrb.mxu2 %v2845_v44  ;;  %v1619_v20 = vand.u32 4294901760, %v1618_v59  ;;  %v3230_v59 = vand.u32 4294901760, %v2924_v17  ;;  %v2975_v51 = vsub.f32 %v490_v4, %v2951_v11  ;;  %v3231_v15 = vand.u32 4294901760, %v2647_v28 }
  0xfc   :  { %1441 = vmatpush.msrb.mxu0 %v3225_v10  ;;  %1602 = vmatpush.msrb.mxu3 %v1601_v32  ;;  %v1624_v61 = vsub.f32 %v2899_v5, %v3226_v16  ;;  %v1630_v32 = vsub.f32 %v2912_v48, %v3228_v42  ;;  %v1641_v10 = vand.u32 4294901760, %v2936_v2  ;;  %v2964_v16 = vand.u32 4294901760, %v488_v12  ;;  %v484_v42 = vld [vmem:[#allocation5 + $0x108] sm:$0xff] }
  0xfd   :  { %1518 = vmatpush.msrb.mxu1 %v2651_v49  ;;  %1553 = vmatpush.msrb.mxu2 %v2849_v63  ;;  %v3232_v28 = vand.u32 4294901760, %v2661_v35 }
  0xfe   :  { %1445 = vmatpush.msrb.mxu0 %v3227_v47  ;;  %1608 = vmatpush.msrb.mxu3 %v1607_v9  ;;  %v1625_v49 = vand.u32 4294901760, %v1624_v61  ;;  %v1636_v9 = vsub.f32 %v2924_v17, %v3230_v59  ;;  %v1647_v47 = vand.u32 4294901760, %v2949_v22  ;;  %v1642_v61 = vsub.f32 %v2936_v2, %v1641_v10 }
  0xff   :  { %1520 = vmatpush.msrb.mxu1 %v2663_v38  ;;  %1555 = vmatpush.msrb.mxu2 %v2858_v18  ;;  %v2979_v38 = vand.u32 4294901760, %v486_v24  ;;  %v2988_v4 = vsub.f32 %v488_v12, %v2964_v16  ;;  %v1659_v59 = vand.u32 4294901760, %v2975_v51  ;;  %v3233_v12 = vand.u32 4294901760, %v2679_v46 }
 0x100   :  { %1449 = vmatpush.msrb.mxu0 %v3229_v6  ;;  %1614 = vmatpush.msrb.mxu3 %v1613_v23  ;;  %v1631_v23 = vand.u32 4294901760, %v1630_v32  ;;  %v1653_v6 = vand.u32 4294901760, %v2962_v55  ;;  %v1648_v32 = vsub.f32 %v2949_v22, %v1647_v47  ;;  %v1643_v35 = vand.u32 4294901760, %v1642_v61 }
 0x101   :  { %1522 = vmatpush.msrb.mxu1 %v2674_v43  ;;  %1557 = vmatpush.msrb.mxu2 %v2875_v31  ;;  %v2992_v43 = vand.u32 4294901760, %v484_v42 }
 0x102   :  { %1453 = vmatpush.msrb.mxu0 %v3231_v15  ;;  %1620 = vmatpush.msrb.mxu3 %v1619_v20  ;;  %v1637_v20 = vand.u32 4294901760, %v1636_v9  ;;  %v1665_v9 = vand.u32 4294901760, %v2988_v4  ;;  %v1649_v46 = vand.u32 4294901760, %v1648_v32  ;;  %v1660_v15 = vsub.f32 %v2975_v51, %v1659_v59 }
 0x103   :  { %1524 = vmatpush.msrb.mxu1 %v2693_v41  ;;  %1559 = vmatpush.msrb.mxu2 %v2888_v21  ;;  %v3003_v41 = vsub.f32 %v486_v24, %v2979_v38  ;;  %v3234_v24 = vand.u32 4294901760, %v2689_v0  ;;  %v3239_v32 = vand.u32 4294901760, %v2754_v56  ;;  %v3242_v56 = vand.u32 4294901760, %v2778_v3  ;;  %v3246_v3 = vld [vmem:[#allocation11_spill] sm:$0xff] }
 0x104   :  { %1457 = vmatpush.msrb.mxu0 %v3232_v28  ;;  %1626 = vmatpush.msrb.mxu3 %v1625_v49  ;;  %v1654_v49 = vsub.f32 %v2962_v55, %v1653_v6  ;;  %v1666_v0 = vsub.f32 %v2988_v4, %v1665_v9  ;;  %v1661_v28 = vand.u32 4294901760, %v1660_v15 }
 0x105   :  { %1526 = vmatpush.msrb.mxu1 %v2707_v7  ;;  %1561 = vmatpush.msrb.mxu2 %v2901_v40  ;;  %v3014_v7 = vsub.f32 %v484_v42, %v2992_v43 }
 0x106   :  { %1461 = vmatpush.msrb.mxu0 %v3233_v12  ;;  %1632 = vmatpush.msrb.mxu3 %v1631_v23  ;;  %v3235_v23 = vand.u32 4294901760, %v2702_v50  ;;  %v1655_v42 = vand.u32 4294901760, %v1654_v49  ;;  %v3243_v12 = vand.u32 4294901760, %v2841_v53  ;;  %v3248_v49 = vld [vmem:[#allocation12_spill] sm:$0xff] }
 0x107   :  { %1528 = vmatpush.msrb.mxu1 %v2720_v39  ;;  %1563 = vmatpush.msrb.mxu2 %v2914_v54  ;;  %v1671_v39 = vand.u32 4294901760, %v3003_v41  ;;  %v1677_v61 = vand.u32 4294901760, %v3014_v7 }
 0x108   :  { %1465 = vmatpush.msrb.mxu0 %v3234_v24  ;;  %1638 = vmatpush.msrb.mxu3 %v1637_v20  ;;  %v3237_v20 = vand.u32 4294901760, %v2730_v37  ;;  %v3249_v24 = vand.u32 4294901760, %v3248_v49 }
 0x109   :  { %1530 = vmatpush.msrb.mxu1 %v2732_v19  ;;  %1565 = vmatpush.msrb.mxu2 %v2926_v58  ;;  %v3236_v19 = vand.u32 4294901760, %v2718_v25  ;;  %v1672_v50 = vsub.f32 %v3003_v41, %v1671_v39  ;;  %v1678_v25 = vsub.f32 %v3014_v7, %v1677_v61 }
 0x10a   :  { %1469 = vmatpush.msrb.mxu0 %v3235_v23  ;;  %1644 = vmatpush.msrb.mxu3 %v1643_v35  ;;  %v3247_v35 = vand.u32 4294901760, %v3246_v3 }
 0x10b   :  { %1532 = vmatpush.msrb.mxu1 %v2744_v52  ;;  %1567 = vmatpush.msrb.mxu2 %v2938_v45  ;;  %v1667_v52 = vand.u32 4294901760, %v1666_v0  ;;  %v1673_v37 = vand.u32 4294901760, %v1672_v50 }
 0x10c   :  { %1473 = vmatpush.msrb.mxu0 %v3236_v19  ;;  %1650 = vmatpush.msrb.mxu3 %v1649_v46 }
 0x10d   :  { %1534 = vmatpush.msrb.mxu1 %v2756_v13  ;;  %1569 = vmatpush.msrb.mxu2 %v2951_v11  ;;  %v3238_v13 = vand.u32 4294901760, %v2742_v36  ;;  %v3240_v36 = vand.u32 4294901760, %v2766_v26  ;;  %v3245_v26 = vand.u32 4294901760, %v2854_v8 }
 0x10e   :  { %1477 = vmatpush.msrb.mxu0 %v3237_v20  ;;  %1656 = vmatpush.msrb.mxu3 %v1655_v42 }
 0x10f   :  { %1536 = vmatpush.msrb.mxu1 %v2768_v57  ;;  %1571 = vmatpush.msrb.mxu2 %v2964_v16  ;;  %v1679_v57 = vand.u32 4294901760, %v1678_v25 }
 0x110   :  { %1481 = vmatpush.msrb.mxu0 %v3238_v13  ;;  %1662 = vmatpush.msrb.mxu3 %v1661_v28 }
 0x111   :  { %1538 = vmatpush.msrb.mxu1 %v2780_v29  ;;  %1573 = vmatpush.msrb.mxu2 %v2979_v38  ;;  %v3241_v29 = vand.u32 4294901760, %v2833_v27 }
 0x112   :  { %1485 = vmatpush.msrb.mxu0 %v3239_v32  ;;  %1668 = vmatpush.msrb.mxu3 %v1667_v52 }
 0x113   :  { %1540 = vmatmul.f32.vlgmr.msrb.gmra.mxu1 %v2541_v33  ;;  %1575 = vmatpush.msrb.mxu2 %v2992_v43 }
 0x114   :  { %1741 = vmatpush.msra.mxu1 %v2816_v62  ;;  %1489 = vmatpush.msrb.mxu0 %v3240_v36 }
 0x115   :  { %1674 = vmatpush.msrb.mxu3 %v1673_v37  ;;  %1581 = vmatmul.f32.vlgmr.msrb.gmra.mxu2 %v2610_v14  ;;  %v3244_v14 = vand.u32 4294901760, %v2790_v60 }
 0x116   :  { %1743 = vmatpush.msra.mxu1 %v2824_v1  ;;  %1782 = vmatpush.msra.mxu2 %v3241_v29 }
 0x117   :  { %1493 = vmatpush.msrb.mxu0 %v3242_v56  ;;  %1680 = vmatpush.msrb.mxu3 %v1679_v57 }
 0x118   :  { %1682 = vmatmul.f32.vlgmr.msrb.gmra.mxu3 %v2574_v30  ;;  %1745 = vmatpush.msra.mxu1 %v2837_v34 }
 0x119   :  { %1786 = vmatpush.msra.mxu2 %v3243_v12  ;;  %1849 = vmatpush.msra.mxu3 %v2816_v62  ;;  %v3250_v62 = vld [vmem:[#allocation13_spill] sm:$0xff] }
 0x11a   :  { %1497 = vmatpush.msrb.mxu0 %v3244_v14  ;;  %1747 = vmatpush.msra.mxu1 %v2845_v44  ;;  %v3251_v60 = vand.u32 4294901760, %v3250_v62  ;;  %v1887_v12 = vld [vmem:[%s3163_s5] sm:$0x3] }
 0x11b   :  { %1790 = vmatpush.msra.mxu2 %v3245_v26  ;;  %1851 = vmatpush.msra.mxu3 %v2824_v1  ;;  %v3252_v1 = vld [vmem:[#allocation14_spill] sm:$0xff] }
 0x11c   :  { %1501 = vmatpush.msrb.mxu0 %v3247_v35  ;;  %1749 = vmatpush.msra.mxu1 %v2849_v63 }
 0x11d   :  { %1503 = vmatmul.f32.vlgmr.msrb.gmra.mxu0 %v2541_v33  ;;  %1794 = vmatpush.msra.mxu2 %v3249_v24  ;;  %v3253_v33 = vand.u32 4294901760, %v3252_v1  ;;  %v1890_v24 = vperm.slane %v1887_v12, 1 }
 0x11e   :  { %1688 = vmatpush.msra.mxu0 %v2833_v27  ;;  %1853 = vmatpush.msra.mxu3 %v2837_v34  ;;  %v3254_v34 = vand.u32 4294901760, %v2899_v5  ;;  %v3255_v27 = vand.u32 4294901760, %v2912_v48 }
 0x11f   :  { %1751 = vmatpush.msra.mxu1 %v2858_v18  ;;  %1798 = vmatpush.msra.mxu2 %v3251_v60 }
 0x120   :  { %1691 = vmatpush.msra.mxu0 %v2841_v53  ;;  %1855 = vmatpush.msra.mxu3 %v2845_v44  ;;  %v3256_v53 = vand.u32 4294901760, %v2924_v17  ;;  %v515_v44 = vld [vmem:[%s3162_s4] sm:$0x3] }
 0x121   :  { %1753 = vmatpush.msra.mxu1 %v2875_v31  ;;  %1802 = vmatpush.msra.mxu2 %v3253_v33 }
 0x122   :  { %1694 = vmatpush.msra.mxu0 %v2854_v8  ;;  %1857 = vmatpush.msra.mxu3 %v2849_v63  ;;  %v517_v8 = vperm.slane %v515_v44, 0 }
 0x123   :  { %1755 = vmatpush.msra.mxu1 %v2888_v21  ;;  %1806 = vmatpush.msra.mxu2 %v3254_v34  ;;  %v1915_v34 = vld [vmem:[#allocation2] ss:$0 sm:$0xff] }
 0x124   :  { %1697 = vmatpush.msra.mxu0 %v3248_v49  ;;  %1859 = vmatpush.msra.mxu3 %v2858_v18  ;;  %v1889_v49 = vperm.slane %v1887_v12, 0 }
 0x125   :  { %1757 = vmatpush.msra.mxu1 %v2901_v40  ;;  %1810 = vmatpush.msra.mxu2 %v3255_v27 }
 0x126   :  { %1700 = vmatpush.msra.mxu0 %v3250_v62  ;;  %1861 = vmatpush.msra.mxu3 %v2875_v31 }
 0x127   :  { %1759 = vmatpush.msra.mxu1 %v2914_v54  ;;  %1814 = vmatpush.msra.mxu2 %v3256_v53 }
 0x128   :  { %1703 = vmatpush.msra.mxu0 %v3252_v1  ;;  %1863 = vmatpush.msra.mxu3 %v2888_v21 }
 0x129   :  { %1761 = vmatpush.msra.mxu1 %v2926_v58  ;;  %1818 = vmatpush.msra.mxu2 %v1641_v10  ;;  %v660_v31 = vpop.f32.mrf.mxu1 }
 0x12a   :  { %1706 = vmatpush.msra.mxu0 %v2899_v5  ;;  %1865 = vmatpush.msra.mxu3 %v2901_v40  ;;  %v3257_v40 = vld [vmem:[#allocation10_spill] sm:$0xff] }
 0x12b   :  { %1763 = vmatpush.msra.mxu1 %v2938_v45  ;;  %1822 = vmatpush.msra.mxu2 %v1647_v47 }
 0x12c   :  { %1709 = vmatpush.msra.mxu0 %v2912_v48  ;;  %1867 = vmatpush.msra.mxu3 %v2914_v54  ;;  %v3258_v54 = vld [vmem:[#allocation9_spill] sm:$0xff] }
 0x12d   :  { %1765 = vmatpush.msra.mxu1 %v2951_v11  ;;  %1826 = vmatpush.msra.mxu2 %v1653_v6 }
 0x12e   :  { %1712 = vmatpush.msra.mxu0 %v2924_v17  ;;  %1869 = vmatpush.msra.mxu3 %v2926_v58 }
 0x12f   :  { %1767 = vmatpush.msra.mxu1 %v2964_v16  ;;  %1830 = vmatpush.msra.mxu2 %v1659_v59 }
 0x130   :  { %1715 = vmatpush.msra.mxu0 %v2936_v2  ;;  %1871 = vmatpush.msra.mxu3 %v2938_v45 }
 0x131   :  { %1769 = vmatpush.msra.mxu1 %v2979_v38  ;;  %1834 = vmatpush.msra.mxu2 %v1665_v9  ;;  %v559_v21 = vpop.f32.mrf.mxu0  ;;  %v714_v63 = vpop.f32.mrf.mxu2 }
 0x132   :  { %1718 = vmatpush.msra.mxu0 %v2949_v22  ;;  %1873 = vmatpush.msra.mxu3 %v2951_v11  ;;  %v859_v18 = vpop.f32.mrf.mxu1  ;;  %v560_v45 = vadd.f32 %v559_v21, %v517_v8  ;;  %v518_v22 = vperm.slane %v515_v44, 1 }
 0x133   :  { %1771 = vmatpush.msra.mxu1 %v2992_v43  ;;  %1838 = vmatpush.msra.mxu2 %v1671_v39  ;;  %v753_v11 = vpop.f32.mrf.mxu3 }
 0x134   :  { %1721 = vmatpush.msra.mxu0 %v2962_v55  ;;  %1875 = vmatpush.msra.mxu3 %v2964_v16  ;;  %v661_v17 = vadd.f32 %v660_v31, %v560_v45 }
 0x135   :  { %1775 = vmatmul.f32.vlgmr.msra.gmra.mxu1 %v3257_v40  ;;  %1842 = vmatpush.msra.mxu2 %v1677_v61 }
 0x136   :  { %1724 = vmatpush.msra.mxu0 %v2975_v51  ;;  %1877 = vmatpush.msra.mxu3 %v2979_v38  ;;  %v715_v55 = vadd.f32 %v714_v63, %v661_v17 }
 0x137   :  { %1844 = vmatmul.f32.vlgmr.msra.gmra.mxu2 %v2574_v30 }
 0x138   :  { %1727 = vmatpush.msra.mxu0 %v2988_v4  ;;  %1879 = vmatpush.msra.mxu3 %v2992_v43  ;;  %v754_v51 = vadd.f32 %v753_v11, %v715_v55 }
 0x139   :  { %1881 = vmatmul.f32.vlgmr.msra.gmra.mxu3 %v2574_v30 }
 0x13a   :  { %1730 = vmatpush.msra.mxu0 %v3003_v41  ;;  %v822_v5 = vpop.f32.mrf.mxu0 }
 0x13b   :  { %v823_v43 = vadd.f32 %v822_v5, %v754_v51 }
 0x13c   :  { %1733 = vmatpush.msra.mxu0 %v3014_v7 }
 0x13d   :  { %1736 = vmatmul.f32.vlgmr.msra.gmra.mxu0 %v3258_v54  ;;  %v860_v9 = vadd.f32 %v859_v18, %v823_v43 }
 0x145   :  { %v900_v30 = vpop.f32.mrf.mxu2 }
 0x146   :  { %v901_v15 = vadd.f32 %v900_v30, %v860_v9 }
 0x148   :  { %v1001_v58 = vpop.f32.mrf.mxu3 }
 0x149   :  { %v1002_v42 = vadd.f32 %v1001_v58, %v901_v15 }
 0x14c   :  { %v1094_v2 = vpop.f32.mrf.mxu1 }
 0x154   :  { %v1163_v16 = vpop.f32.mrf.mxu2 }
 0x156   :  { %v1055_v48 = vpop.f32.mrf.mxu0 }
 0x157   :  { %v1200_v38 = vpop.f32.mrf.mxu3  ;;  %v1056_v61 = vadd.f32 %v1055_v48, %v1002_v42 }
 0x159   :  { %v1095_v50 = vadd.f32 %v1094_v2, %v1056_v61 }
 0x15b   :  { %v1164_v25 = vadd.f32 %v1163_v16, %v1095_v50 }
 0x15d   :  { %v1201_v36 = vadd.f32 %v1200_v38, %v1164_v25 }
 0x15f   :  { %v1885_v3 = vmax.f32 %v1201_v36, 0.0 }
 0x161   :  { %v1893_v60 = vmul.f32 %v1889_v49, %v1885_v3 }
 0x16e   :  { %v1342_v6 = vpop.f32.mrf.mxu1 }
 0x176   :  { %v1396_v59 = vpop.f32.mrf.mxu2 }
 0x178   :  { %v1241_v10 = vpop.f32.mrf.mxu0 }
 0x179   :  { %v1242_v47 = vadd.f32 %v1241_v10, %v518_v22  ;;  %v1435_v7 = vpop.f32.mrf.mxu3 }
 0x17b   :  { %v1343_v4 = vadd.f32 %v1342_v6, %v1242_v47 }
 0x17d   :  { %v1397_v41 = vadd.f32 %v1396_v59, %v1343_v4 }
 0x17f   :  { %v1436_v39 = vadd.f32 %v1435_v7, %v1397_v41 }
 0x190   :  { %v1541_v0 = vpop.f32.mrf.mxu1 }
 0x198   :  { %v1582_v28 = vpop.f32.mrf.mxu2 }
 0x19a   :  { %v1504_v46 = vpop.f32.mrf.mxu0 }
 0x19b   :  { %v1505_v23 = vadd.f32 %v1504_v46, %v1436_v39  ;;  %v1683_v52 = vpop.f32.mrf.mxu3 }
 0x19d   :  { %v1542_v19 = vadd.f32 %v1541_v0, %v1505_v23 }
 0x19f   :  { %v1583_v20 = vadd.f32 %v1582_v28, %v1542_v19 }
 0x1a1   :  { %v1684_v13 = vadd.f32 %v1683_v52, %v1583_v20 }
 0x1b2   :  { %v1776_v57 = vpop.f32.mrf.mxu1 }
 0x1ba   :  { %v1737_v37 = vpop.f32.mrf.mxu0  ;;  %v1845_v56 = vpop.f32.mrf.mxu2 }
 0x1bb   :  { %v1738_v32 = vadd.f32 %v1737_v37, %v1684_v13 }
 0x1bc   :  { %v1882_v26 = vpop.f32.mrf.mxu3 }
 0x1bd   :  { %v1777_v29 = vadd.f32 %v1776_v57, %v1738_v32 }
 0x1bf   :  { %v1846_v14 = vadd.f32 %v1845_v56, %v1777_v29 }
 0x1c1   :  { %v1883_v35 = vadd.f32 %v1882_v26, %v1846_v14 }
 0x1c3   :  { %v1886_v62 = vmax.f32 %v1883_v35, 0.0 }
 0x1c5   :  { %v1894_v1 = vmul.f32 %v1890_v24, %v1886_v62 }
 0x1c7   :  { %v1895_v33 = vadd.f32 %v1894_v1, %v1893_v60 }
 0x1c9   :  { %1896 = vadd.xlane.f32.xlu0 %v1895_v33 }
 0x23c   :  { %v1897_v27 = vpop.xlane.xlu0 %1896 }
 0x23d   :  { %v1902_v53 = vadd.f32 %v1915_v34, %v1897_v27 }
 0x23f   :  { %1904 = vst.msk [vmem:[%s3165_s7] sm:$0xff] %vm1903_vm1, %v1902_v53 }
 0x240   :  { %1909 = vsyncpa [#allocation4], 1 }
 0x241   :  { %1910 = vsyncpa [#allocation6], 1 }

</bundles_post_ra>
